<compile_context>
chip_gen: v5e
topology: v5e:2x2
jax: 0.10.0
libtpu: 0.0.40
codegen_flags: <defaults>
</compile_context>

<pallas_src>
import functools

import numpy as np
import jax
import jax.numpy as jnp
from jax.experimental import pallas as pl
from jax.experimental.pallas import tpu as pltpu


# ----------------------------------------------------------------------------
# Fixed bilinear x2 (align_corners=False) stencil as a small dense matrix.
# ----------------------------------------------------------------------------
@functools.lru_cache(maxsize=None)
def _bilinear_up2_matrix(size_in: int) -> np.ndarray:
    """(2*size_in, size_in) matrix M with  out = M @ in  matching
    F.interpolate(..., scale_factor=2, mode='bilinear', align_corners=False)
    along one axis (weights are only 0.0 / 0.25 / 0.75 / 1.0)."""
    size_out = 2 * size_in
    m = np.zeros((size_out, size_in), np.float32)
    for o in range(size_out):
        src = (o + 0.5) * 0.5 - 0.5
        src = min(max(src, 0.0), float(size_in - 1))
        lo = int(np.floor(src))
        hi = min(lo + 1, size_in - 1)
        f = src - lo
        m[o, lo] += 1.0 - f
        m[o, hi] += f
    return m


# ----------------------------------------------------------------------------
# Small helpers.
# ----------------------------------------------------------------------------
def _largest_divisor_leq(n: int, cap: int) -> int:
    cap = int(max(1, min(n, cap)))
    for d in range(cap, 0, -1):
        if n % d == 0:
            return d
    return 1


def _vmem_limit(footprint_bytes: int) -> int:
    # Actual block footprint + headroom, clamped well below v7x's 64 MiB.
    return int(min(48 << 20, max(24 << 20, footprint_bytes + (8 << 20))))


def _invariant_spec(block_shape, index_map):
    """BlockSpec for a grid-invariant operand; single-buffered when supported."""
    try:
        return pl.BlockSpec(block_shape, index_map, pipeline_mode=pl.Buffered(1))
    except Exception:  # older jax: no pipeline_mode / Buffered
        return pl.BlockSpec(block_shape, index_map)


# ----------------------------------------------------------------------------
# Kernel 1: 1x1 conv (channel mix) on the lane-merged (Cin, H*W) view.
# ----------------------------------------------------------------------------
def _mix_kernel(x_ref, w_ref, o_ref):
    # x_ref: (1, Cin, TS) bf16 ; w_ref: (Cout, Cin) bf16 ; o_ref: (1, Cout, TS)
    o_ref[0] = jnp.dot(w_ref[...], x_ref[0],
                       preferred_element_type=jnp.float32).astype(o_ref.dtype)


def _channel_mix(x, w):
    """1x1 conv, no bias: (N, Cin, H, W) -> (N, Cout, H, W) bf16."""
    N, Cin, H, W = x.shape
    Cout = int(w.shape[0])
    S = H * W

    xs = x.reshape(N, Cin, S).astype(jnp.bfloat16)   # free row-major view
    wm = w.reshape(Cout, Cin).astype(jnp.bfloat16)

    # Spatial tile: lane-dense (multiple of 128) and small enough that the
    # double-buffered x / out blocks stay a few MiB per step.
    cap = max(128, (6 << 20) // max(1, 2 * (Cin + Cout)))
    if S <= cap or S % 128 != 0:
        TS = S
    else:
        TS = 128 * _largest_divisor_leq(S // 128, cap // 128)

    grid = (N, pl.cdiv(S, TS))
    foot = 2 * (Cin * TS * 2) + Cout * Cin * 2 + 2 * (Cout * TS * 2)

    out = pl.pallas_call(
        _mix_kernel,
        grid=grid,
        in_specs=[
            pl.BlockSpec((1, Cin, TS), lambda n, s: (n, 0, s)),
            _invariant_spec((Cout, Cin), lambda n, s: (0, 0)),
        ],
        out_specs=pl.BlockSpec((1, Cout, TS), lambda n, s: (n, 0, s)),
        out_shape=jax.ShapeDtypeStruct((N, Cout, S), jnp.bfloat16),
        compiler_params=pltpu.CompilerParams(
            dimension_semantics=("parallel", "parallel"),
            vmem_limit_bytes=_vmem_limit(foot)),
        cost_estimate=pl.CostEstimate(
            flops=2 * N * Cout * Cin * S,
            transcendentals=0,
            bytes_accessed=2 * N * S * (Cin + Cout) + 2 * Cout * Cin),
    )(xs, wm)

    return out.reshape(N, Cout, H, W)


# ----------------------------------------------------------------------------
# Kernel 2: separable bilinear x2 (align_corners=False) as two batched matmuls.
# ----------------------------------------------------------------------------
def _up2_kernel(z_ref, uh_ref, uwt_ref, o_ref):
    # z_ref: (1, TC, H, W) bf16 ; uh_ref: (2H, H) bf16 ; uwt_ref: (W, 2W) bf16
    # o_ref: (1, TC, 2H, 2W)
    z = z_ref[0]                                     # (TC, H, W)
    tc = z.shape[0]
    uh = jnp.broadcast_to(uh_ref[...][None], (tc,) + uh_ref.shape)    # (TC,2H,H)
    uwt = jnp.broadcast_to(uwt_ref[...][None], (tc,) + uwt_ref.shape)  # (TC,W,2W)
    # vertical x2 then horizontal x2, batched over the channel tile
    u = jnp.einsum('cph,chw->cpw', uh, z, preferred_element_type=jnp.float32)
    y = jnp.einsum('cpw,cwv->cpv', u.astype(jnp.bfloat16), uwt,
                   preferred_element_type=jnp.float32)
    o_ref[0] = y.astype(o_ref.dtype)


def _bilinear_up2(z, out_dtype):
    """Bilinear x2 upsample: (N, C, H, W) -> (N, C, 2H, 2W)."""
    N, C, H, W = z.shape
    uh = jnp.asarray(_bilinear_up2_matrix(H), dtype=jnp.bfloat16)       # (2H, H)
    uwt = jnp.asarray(_bilinear_up2_matrix(W).T, dtype=jnp.bfloat16)    # (W, 2W)

    ob = jnp.dtype(out_dtype).itemsize
    # rough per-channel VMEM bytes/step: z dbuf + u f32 + f32 temps + out dbuf
    per_c = H * W * (4 + 8 + 16 + 8 * ob)
    TC = _largest_divisor_leq(C, max(1, (6 << 20) // per_c))

    grid = (N, C // TC)
    foot = (2 * TC * H * W * 2 + (2 * H * H + 2 * W * W) * 2
            + 2 * TC * 4 * H * W * ob + TC * H * W * 24)

    out = pl.pallas_call(
        _up2_kernel,
        grid=grid,
        in_specs=[
            pl.BlockSpec((1, TC, H, W), lambda n, c: (n, c, 0, 0)),
            _invariant_spec((2 * H, H), lambda n, c: (0, 0)),
            _invariant_spec((W, 2 * W), lambda n, c: (0, 0)),
        ],
        out_specs=pl.BlockSpec((1, TC, 2 * H, 2 * W), lambda n, c: (n, c, 0, 0)),
        out_shape=jax.ShapeDtypeStruct((N, C, 2 * H, 2 * W), out_dtype),
        compiler_params=pltpu.CompilerParams(
            dimension_semantics=("parallel", "parallel"),
            vmem_limit_bytes=_vmem_limit(foot)),
        cost_estimate=pl.CostEstimate(
            flops=N * C * (4 * H * H * W + 8 * H * W * W),
            transcendentals=0,
            bytes_accessed=N * C * H * W * (2 + 4 * ob)
                           + (2 * H * H + 2 * W * W) * 2),
    )(z.astype(jnp.bfloat16), uh, uwt)

    return out


# ----------------------------------------------------------------------------
# One Up stage and the full UpSample forward.
# ----------------------------------------------------------------------------
def _up_stage(x, w, out_dtype):
    z = _channel_mix(x, w)                 # 1x1 conv, bf16 hand-off
    return _bilinear_up2(z, out_dtype)     # separable bilinear x2


@jax.jit
def upsample_forward(weights, x):
    """UpSample.forward: sequential Up stages (channels /2, spatial x2 each).
    Intermediate stages are bf16; the final stage is f32."""
    n = len(weights)
    for i, w in enumerate(weights):
        x = _up_stage(x, w, jnp.float32 if i == n - 1 else jnp.bfloat16)
    return x


# ----------------------------------------------------------------------------
# Parameter init mirroring the PyTorch module structure.
# ----------------------------------------------------------------------------
def init_upsample_params(key, in_channels, scale_factor, chan_factor=2):
    n_stages = int(np.log2(scale_factor))
    ws = []
    ch = in_channels
    for _ in range(n_stages):
        key, sub = jax.random.split(key)
        cout = int(ch // chan_factor)
        k = 1.0 / np.sqrt(ch)   # PyTorch Conv2d default: U(-1/sqrt(fan_in), .)
        ws.append(jax.random.uniform(sub, (cout, ch, 1, 1), jnp.float32, -k, k))
        ch = cout
    return tuple(ws)


# ----------------------------------------------------------------------------
# Pure-JAX float32 reference (independent gather-based bilinear) for checking.
# ----------------------------------------------------------------------------
def _upsample2_bilinear_ref(x):
    N, C, H, W = x.shape

    def coords(o, size):
        src = (np.arange(o, dtype=np.float32) + 0.5) * 0.5 - 0.5
        src = np.clip(src, 0.0, size - 1)
        lo = np.floor(src).astype(np.int32)
        hi = np.minimum(lo + 1, size - 1)
        return lo, hi, src - lo

    y0, y1, fy = coords(2 * H, H)
    x0, x1, fx = coords(2 * W, W)
    fy = jnp.asarray(fy)[None, None, :, None]
    fx = jnp.asarray(fx)[None, None, None, :]
    top = x[:, :, y0, :] * (1.0 - fy) + x[:, :, y1, :] * fy
    return top[:, :, :, x0] * (1.0 - fx) + top[:, :, :, x1] * fx


def upsample_forward_ref(weights, x):
    for w in weights:
        cout, cin = w.shape[0], w.shape[1]
        x = jnp.einsum('oc,nchw->nohw', w.reshape(cout, cin), x)
        x = _upsample2_bilinear_ref(x)
    return x


# ----------------------------------------------------------------------------
if __name__ == "__main__":
    key = jax.random.PRNGKey(0)
    # Small shapes consistent with the module:
    #   UpSample(in_channels=16, scale_factor=4, chan_factor=2)
    #   -> two Up stages: 16 -> 8 -> 4 channels, spatial 16 -> 32 -> 64.
    in_channels, scale_factor, chan_factor = 16, 4, 2
    N, H, W = 2, 16, 16

    k_x, k_p = jax.random.split(key)
    x = jax.random.normal(k_x, (N, in_channels, H, W), dtype=jnp.float32)
    weights = init_upsample_params(k_p, in_channels, scale_factor, chan_factor)

    out = jax.block_until_ready(upsample_forward(weights, x))

    n_stages = int(np.log2(scale_factor))
    exp_c = in_channels // (chan_factor ** n_stages)
    assert out.shape == (N, exp_c, H * 2 ** n_stages, W * 2 ** n_stages), out.shape
    assert out.dtype == jnp.float32
    assert bool(jnp.all(jnp.isfinite(out)))

    # Loose tolerance: bf16 operands / bf16 intermediates, f32 MXU accumulation.
    ref = upsample_forward_ref(weights, x)
    max_err = float(jnp.max(jnp.abs(out - ref)))
    assert max_err < 1e-1, f"max abs error vs float32 reference: {max_err}"

    print("KERNEL_OK")
</pallas_src>

<mosaic_0001>
module attributes {stable_mosaic.version = 11 : i64} {
  func.func @_mix_kernel(%arg0: i32, %arg1: i32, %arg2: memref<1x16x256xbf16, #tpu.memory_space<vmem>>, %arg3: memref<8x16xbf16, #tpu.memory_space<vmem>>, %arg4: memref<1x8x256xbf16, #tpu.memory_space<vmem>>) attributes {dimension_semantics = [#tpu.dimension_semantics<parallel>, #tpu.dimension_semantics<parallel>], iteration_bounds = array<i64: 2, 1>, scalar_prefetch = 0 : i64, scratch_operands = 0 : i64, tpu.core_type = #tpu.core_type<tc>, window_params = [{transform_indices = @transform_0, window_bounds = array<i64: 1, 16, 256>}, {pipeline_mode = #tpu.pipeline_mode<synchronous>, transform_indices = @transform_1, window_bounds = array<i64: 8, 16>}, {transform_indices = @transform_2, window_bounds = array<i64: 1, 8, 256>}]} {
    %c0 = arith.constant 0 : index
    %c0_0 = arith.constant 0 : index
    %0 = vector.load %arg3[%c0, %c0_0] : memref<8x16xbf16, #tpu.memory_space<vmem>>, vector<8x16xbf16>
    %c0_1 = arith.constant 0 : index
    %c0_2 = arith.constant 0 : index
    %c0_3 = arith.constant 0 : index
    %1 = vector.load %arg2[%c0_1, %c0_2, %c0_3] : memref<1x16x256xbf16, #tpu.memory_space<vmem>>, vector<1x16x256xbf16>
    %2 = vector.shape_cast %1 : vector<1x16x256xbf16> to vector<16x256xbf16>
    %cst = arith.constant dense<0.000000e+00> : vector<8x256xf32>
    %3 = tpu.matmul %0, %2, %cst {dimension_numbers = #tpu.dot_dimension_numbers<[1], [0], [0], [1], [0, 0, 1, 1], [], []>} : vector<8x16xbf16>, vector<16x256xbf16>, vector<8x256xf32> -> vector<8x256xf32>
    %4 = arith.truncf %3 : vector<8x256xf32> to vector<8x256xbf16>
    %c0_4 = arith.constant 0 : index
    %c0_5 = arith.constant 0 : index
    %c0_6 = arith.constant 0 : index
    %5 = vector.load %arg4[%c0_4, %c0_5, %c0_6] : memref<1x8x256xbf16, #tpu.memory_space<vmem>>, vector<1x8x256xbf16>
    %6 = vector.shape_cast %5 : vector<1x8x256xbf16> to vector<8x256xbf16>
    %7 = vector.shape_cast %4 : vector<8x256xbf16> to vector<1x8x256xbf16>
    tpu.vector_store %arg4[%c0_4, %c0_5, %c0_6], %7 {strides = array<i32>} : memref<1x8x256xbf16, #tpu.memory_space<vmem>>, vector<1x8x256xbf16>,
    return
  }
  func.func @transform_0(%arg0: i32, %arg1: i32) -> (i32, i32, i32) {
    %c0_i32 = arith.constant 0 : i32
    %c0_i32_0 = arith.constant 0 : i32
    return %arg0, %c0_i32, %arg1 : i32, i32, i32
  }
  func.func @transform_1(%arg0: i32, %arg1: i32) -> (i32, i32) {
    %c0_i32 = arith.constant 0 : i32
    %c0_i32_0 = arith.constant 0 : i32
    %c0_i32_1 = arith.constant 0 : i32
    return %c0_i32, %c0_i32_0 : i32, i32
  }
  func.func @transform_2(%arg0: i32, %arg1: i32) -> (i32, i32, i32) {
    %c0_i32 = arith.constant 0 : i32
    %c0_i32_0 = arith.constant 0 : i32
    return %arg0, %c0_i32, %arg1 : i32, i32, i32
  }
}

module attributes {stable_mosaic.version = 11 : i64} {
  func.func @_up2_kernel(%arg0: i32, %arg1: i32, %arg2: memref<1x8x16x16xbf16, #tpu.memory_space<vmem>>, %arg3: memref<32x16xbf16, #tpu.memory_space<vmem>>, %arg4: memref<16x32xbf16, #tpu.memory_space<vmem>>, %arg5: memref<1x8x32x32xbf16, #tpu.memory_space<vmem>>) attributes {dimension_semantics = [#tpu.dimension_semantics<parallel>, #tpu.dimension_semantics<parallel>], iteration_bounds = array<i64: 2, 1>, scalar_prefetch = 0 : i64, scratch_operands = 0 : i64, tpu.core_type = #tpu.core_type<tc>, window_params = [{transform_indices = @transform_0, window_bounds = array<i64: 1, 8, 16, 16>}, {pipeline_mode = #tpu.pipeline_mode<synchronous>, transform_indices = @transform_1, window_bounds = array<i64: 32, 16>}, {pipeline_mode = #tpu.pipeline_mode<synchronous>, transform_indices = @transform_2, window_bounds = array<i64: 16, 32>}, {transform_indices = @transform_3, window_bounds = array<i64: 1, 8, 32, 32>}]} {
    %c0 = arith.constant 0 : index
    %c0_0 = arith.constant 0 : index
    %c0_1 = arith.constant 0 : index
    %c0_2 = arith.constant 0 : index
    %0 = vector.load %arg2[%c0, %c0_0, %c0_1, %c0_2] : memref<1x8x16x16xbf16, #tpu.memory_space<vmem>>, vector<1x8x16x16xbf16>
    %1 = vector.shape_cast %0 : vector<1x8x16x16xbf16> to vector<8x16x16xbf16>
    %c0_3 = arith.constant 0 : index
    %c0_4 = arith.constant 0 : index
    %2 = vector.load %arg3[%c0_3, %c0_4] : memref<32x16xbf16, #tpu.memory_space<vmem>>, vector<32x16xbf16>
    %3 = vector.shape_cast %2 : vector<32x16xbf16> to vector<1x32x16xbf16>
    %4 = vector.shape_cast %3 : vector<1x32x16xbf16> to vector<1x32x16xbf16>
    %5 = vector.broadcast %4 : vector<1x32x16xbf16> to vector<8x32x16xbf16>
    %c0_5 = arith.constant 0 : index
    %c0_6 = arith.constant 0 : index
    %6 = vector.load %arg4[%c0_5, %c0_6] : memref<16x32xbf16, #tpu.memory_space<vmem>>, vector<16x32xbf16>
    %7 = vector.shape_cast %6 : vector<16x32xbf16> to vector<1x16x32xbf16>
    %8 = vector.shape_cast %7 : vector<1x16x32xbf16> to vector<1x16x32xbf16>
    %9 = vector.broadcast %8 : vector<1x16x32xbf16> to vector<8x16x32xbf16>
    "tpu.trace_start"() <{level = 10 : i32, message = "cph,chw->cpw"}> : () -> ()
    %cst = arith.constant dense<0.000000e+00> : vector<8x32x16xf32>
    %10 = tpu.matmul %5, %1, %cst {dimension_numbers = #tpu.dot_dimension_numbers<[2], [1], [1], [2], [0, 0, 0, 1, 1, 2], [0], [0]>} : vector<8x32x16xbf16>, vector<8x16x16xbf16>, vector<8x32x16xf32> -> vector<8x32x16xf32>
    "tpu.trace_stop"() : () -> ()
    %11 = arith.truncf %10 : vector<8x32x16xf32> to vector<8x32x16xbf16>
    "tpu.trace_start"() <{level = 10 : i32, message = "cpw,cwv->cpv"}> : () -> ()
    %cst_7 = arith.constant dense<0.000000e+00> : vector<8x32x32xf32>
    %12 = tpu.matmul %11, %9, %cst_7 {dimension_numbers = #tpu.dot_dimension_numbers<[2], [1], [1], [2], [0, 0, 0, 1, 1, 2], [0], [0]>} : vector<8x32x16xbf16>, vector<8x16x32xbf16>, vector<8x32x32xf32> -> vector<8x32x32xf32>
    "tpu.trace_stop"() : () -> ()
    %13 = arith.truncf %12 : vector<8x32x32xf32> to vector<8x32x32xbf16>
    %c0_8 = arith.constant 0 : index
    %c0_9 = arith.constant 0 : index
    %c0_10 = arith.constant 0 : index
    %c0_11 = arith.constant 0 : index
    %14 = vector.load %arg5[%c0_8, %c0_9, %c0_10, %c0_11] : memref<1x8x32x32xbf16, #tpu.memory_space<vmem>>, vector<1x8x32x32xbf16>
    %15 = vector.shape_cast %14 : vector<1x8x32x32xbf16> to vector<8x32x32xbf16>
    %16 = vector.shape_cast %13 : vector<8x32x32xbf16> to vector<1x8x32x32xbf16>
    tpu.vector_store %arg5[%c0_8, %c0_9, %c0_10, %c0_11], %16 {strides = array<i32>} : memref<1x8x32x32xbf16, #tpu.memory_space<vmem>>, vector<1x8x32x32xbf16>,
    return
  }
  func.func @transform_0(%arg0: i32, %arg1: i32) -> (i32, i32, i32, i32) {
    %c0_i32 = arith.constant 0 : i32
    %c0_i32_0 = arith.constant 0 : i32
    %c0_i32_1 = arith.constant 0 : i32
    return %arg0, %arg1, %c0_i32, %c0_i32_0 : i32, i32, i32, i32
  }
  func.func @transform_1(%arg0: i32, %arg1: i32) -> (i32, i32) {
    %c0_i32 = arith.constant 0 : i32
    %c0_i32_0 = arith.constant 0 : i32
    %c0_i32_1 = arith.constant 0 : i32
    return %c0_i32, %c0_i32_0 : i32, i32
  }
  func.func @transform_2(%arg0: i32, %arg1: i32) -> (i32, i32) {
    %c0_i32 = arith.constant 0 : i32
    %c0_i32_0 = arith.constant 0 : i32
    %c0_i32_1 = arith.constant 0 : i32
    return %c0_i32, %c0_i32_0 : i32, i32
  }
  func.func @transform_3(%arg0: i32, %arg1: i32) -> (i32, i32, i32, i32) {
    %c0_i32 = arith.constant 0 : i32
    %c0_i32_0 = arith.constant 0 : i32
    %c0_i32_1 = arith.constant 0 : i32
    return %arg0, %arg1, %c0_i32, %c0_i32_0 : i32, i32, i32, i32
  }
}

module attributes {stable_mosaic.version = 11 : i64} {
  func.func @_mix_kernel(%arg0: i32, %arg1: i32, %arg2: memref<1x8x1024xbf16, #tpu.memory_space<vmem>>, %arg3: memref<4x8xbf16, #tpu.memory_space<vmem>>, %arg4: memref<1x4x1024xbf16, #tpu.memory_space<vmem>>) attributes {dimension_semantics = [#tpu.dimension_semantics<parallel>, #tpu.dimension_semantics<parallel>], iteration_bounds = array<i64: 2, 1>, scalar_prefetch = 0 : i64, scratch_operands = 0 : i64, tpu.core_type = #tpu.core_type<tc>, window_params = [{transform_indices = @transform_0, window_bounds = array<i64: 1, 8, 1024>}, {pipeline_mode = #tpu.pipeline_mode<synchronous>, transform_indices = @transform_1, window_bounds = array<i64: 4, 8>}, {transform_indices = @transform_2, window_bounds = array<i64: 1, 4, 1024>}]} {
    %c0 = arith.constant 0 : index
    %c0_0 = arith.constant 0 : index
    %0 = vector.load %arg3[%c0, %c0_0] : memref<4x8xbf16, #tpu.memory_space<vmem>>, vector<4x8xbf16>
    %c0_1 = arith.constant 0 : index
    %c0_2 = arith.constant 0 : index
    %c0_3 = arith.constant 0 : index
    %1 = vector.load %arg2[%c0_1, %c0_2, %c0_3] : memref<1x8x1024xbf16, #tpu.memory_space<vmem>>, vector<1x8x1024xbf16>
    %2 = vector.shape_cast %1 : vector<1x8x1024xbf16> to vector<8x1024xbf16>
    %cst = arith.constant dense<0.000000e+00> : vector<4x1024xf32>
    %3 = tpu.matmul %0, %2, %cst {dimension_numbers = #tpu.dot_dimension_numbers<[1], [0], [0], [1], [0, 0, 1, 1], [], []>} : vector<4x8xbf16>, vector<8x1024xbf16>, vector<4x1024xf32> -> vector<4x1024xf32>
    %4 = arith.truncf %3 : vector<4x1024xf32> to vector<4x1024xbf16>
    %c0_4 = arith.constant 0 : index
    %c0_5 = arith.constant 0 : index
    %c0_6 = arith.constant 0 : index
    %5 = vector.load %arg4[%c0_4, %c0_5, %c0_6] : memref<1x4x1024xbf16, #tpu.memory_space<vmem>>, vector<1x4x1024xbf16>
    %6 = vector.shape_cast %5 : vector<1x4x1024xbf16> to vector<4x1024xbf16>
    %7 = vector.shape_cast %4 : vector<4x1024xbf16> to vector<1x4x1024xbf16>
    tpu.vector_store %arg4[%c0_4, %c0_5, %c0_6], %7 {strides = array<i32>} : memref<1x4x1024xbf16, #tpu.memory_space<vmem>>, vector<1x4x1024xbf16>,
    return
  }
  func.func @transform_0(%arg0: i32, %arg1: i32) -> (i32, i32, i32) {
    %c0_i32 = arith.constant 0 : i32
    %c0_i32_0 = arith.constant 0 : i32
    return %arg0, %c0_i32, %arg1 : i32, i32, i32
  }
  func.func @transform_1(%arg0: i32, %arg1: i32) -> (i32, i32) {
    %c0_i32 = arith.constant 0 : i32
    %c0_i32_0 = arith.constant 0 : i32
    %c0_i32_1 = arith.constant 0 : i32
    return %c0_i32, %c0_i32_0 : i32, i32
  }
  func.func @transform_2(%arg0: i32, %arg1: i32) -> (i32, i32, i32) {
    %c0_i32 = arith.constant 0 : i32
    %c0_i32_0 = arith.constant 0 : i32
    return %arg0, %c0_i32, %arg1 : i32, i32, i32
  }
}

module attributes {stable_mosaic.version = 11 : i64} {
  func.func @_up2_kernel(%arg0: i32, %arg1: i32, %arg2: memref<1x4x32x32xbf16, #tpu.memory_space<vmem>>, %arg3: memref<64x32xbf16, #tpu.memory_space<vmem>>, %arg4: memref<32x64xbf16, #tpu.memory_space<vmem>>, %arg5: memref<1x4x64x64xf32, #tpu.memory_space<vmem>>) attributes {dimension_semantics = [#tpu.dimension_semantics<parallel>, #tpu.dimension_semantics<parallel>], iteration_bounds = array<i64: 2, 1>, scalar_prefetch = 0 : i64, scratch_operands = 0 : i64, tpu.core_type = #tpu.core_type<tc>, window_params = [{transform_indices = @transform_0, window_bounds = array<i64: 1, 4, 32, 32>}, {pipeline_mode = #tpu.pipeline_mode<synchronous>, transform_indices = @transform_1, window_bounds = array<i64: 64, 32>}, {pipeline_mode = #tpu.pipeline_mode<synchronous>, transform_indices = @transform_2, window_bounds = array<i64: 32, 64>}, {transform_indices = @transform_3, window_bounds = array<i64: 1, 4, 64, 64>}]} {
    %c0 = arith.constant 0 : index
    %c0_0 = arith.constant 0 : index
    %c0_1 = arith.constant 0 : index
    %c0_2 = arith.constant 0 : index
    %0 = vector.load %arg2[%c0, %c0_0, %c0_1, %c0_2] : memref<1x4x32x32xbf16, #tpu.memory_space<vmem>>, vector<1x4x32x32xbf16>
    %1 = vector.shape_cast %0 : vector<1x4x32x32xbf16> to vector<4x32x32xbf16>
    %c0_3 = arith.constant 0 : index
    %c0_4 = arith.constant 0 : index
    %2 = vector.load %arg3[%c0_3, %c0_4] : memref<64x32xbf16, #tpu.memory_space<vmem>>, vector<64x32xbf16>
    %3 = vector.shape_cast %2 : vector<64x32xbf16> to vector<1x64x32xbf16>
    %4 = vector.shape_cast %3 : vector<1x64x32xbf16> to vector<1x64x32xbf16>
    %5 = vector.broadcast %4 : vector<1x64x32xbf16> to vector<4x64x32xbf16>
    %c0_5 = arith.constant 0 : index
    %c0_6 = arith.constant 0 : index
    %6 = vector.load %arg4[%c0_5, %c0_6] : memref<32x64xbf16, #tpu.memory_space<vmem>>, vector<32x64xbf16>
    %7 = vector.shape_cast %6 : vector<32x64xbf16> to vector<1x32x64xbf16>
    %8 = vector.shape_cast %7 : vector<1x32x64xbf16> to vector<1x32x64xbf16>
    %9 = vector.broadcast %8 : vector<1x32x64xbf16> to vector<4x32x64xbf16>
    "tpu.trace_start"() <{level = 10 : i32, message = "cph,chw->cpw"}> : () -> ()
    %cst = arith.constant dense<0.000000e+00> : vector<4x64x32xf32>
    %10 = tpu.matmul %5, %1, %cst {dimension_numbers = #tpu.dot_dimension_numbers<[2], [1], [1], [2], [0, 0, 0, 1, 1, 2], [0], [0]>} : vector<4x64x32xbf16>, vector<4x32x32xbf16>, vector<4x64x32xf32> -> vector<4x64x32xf32>
    "tpu.trace_stop"() : () -> ()
    %11 = arith.truncf %10 : vector<4x64x32xf32> to vector<4x64x32xbf16>
    "tpu.trace_start"() <{level = 10 : i32, message = "cpw,cwv->cpv"}> : () -> ()
    %cst_7 = arith.constant dense<0.000000e+00> : vector<4x64x64xf32>
    %12 = tpu.matmul %11, %9, %cst_7 {dimension_numbers = #tpu.dot_dimension_numbers<[2], [1], [1], [2], [0, 0, 0, 1, 1, 2], [0], [0]>} : vector<4x64x32xbf16>, vector<4x32x64xbf16>, vector<4x64x64xf32> -> vector<4x64x64xf32>
    "tpu.trace_stop"() : () -> ()
    %c0_8 = arith.constant 0 : index
    %c0_9 = arith.constant 0 : index
    %c0_10 = arith.constant 0 : index
    %c0_11 = arith.constant 0 : index
    %13 = vector.load %arg5[%c0_8, %c0_9, %c0_10, %c0_11] : memref<1x4x64x64xf32, #tpu.memory_space<vmem>>, vector<1x4x64x64xf32>
    %14 = vector.shape_cast %13 : vector<1x4x64x64xf32> to vector<4x64x64xf32>
    %15 = vector.shape_cast %12 : vector<4x64x64xf32> to vector<1x4x64x64xf32>
    tpu.vector_store %arg5[%c0_8, %c0_9, %c0_10, %c0_11], %15 {strides = array<i32>} : memref<1x4x64x64xf32, #tpu.memory_space<vmem>>, vector<1x4x64x64xf32>,
    return
  }
  func.func @transform_0(%arg0: i32, %arg1: i32) -> (i32, i32, i32, i32) {
    %c0_i32 = arith.constant 0 : i32
    %c0_i32_0 = arith.constant 0 : i32
    %c0_i32_1 = arith.constant 0 : i32
    return %arg0, %arg1, %c0_i32, %c0_i32_0 : i32, i32, i32, i32
  }
  func.func @transform_1(%arg0: i32, %arg1: i32) -> (i32, i32) {
    %c0_i32 = arith.constant 0 : i32
    %c0_i32_0 = arith.constant 0 : i32
    %c0_i32_1 = arith.constant 0 : i32
    return %c0_i32, %c0_i32_0 : i32, i32
  }
  func.func @transform_2(%arg0: i32, %arg1: i32) -> (i32, i32) {
    %c0_i32 = arith.constant 0 : i32
    %c0_i32_0 = arith.constant 0 : i32
    %c0_i32_1 = arith.constant 0 : i32
    return %c0_i32, %c0_i32_0 : i32, i32
  }
  func.func @transform_3(%arg0: i32, %arg1: i32) -> (i32, i32, i32, i32) {
    %c0_i32 = arith.constant 0 : i32
    %c0_i32_0 = arith.constant 0 : i32
    %c0_i32_1 = arith.constant 0 : i32
    return %arg0, %arg1, %c0_i32, %c0_i32_0 : i32, i32, i32, i32
  }
}

</mosaic_0001>

<bundles_post_ra>
// kernel: upsample_forward.4
= control target key start
LH: loop header
LB: loop body
LE: loop exit
PB: predicated region body
PF: predicated region fallthrough
CT: control target
= control target key end

     0   :  { %s404_s9 = smov 0   ;;  %s406_s10 = smov 0   ;;  %s440_s0 = inlined_call_operand.vmem [shape: bf16[2,16,256], index: 0, kind: input, shape index: {}]   ;;  %s441_s1 = inlined_call_operand.vmem [shape: bf16[8,16], index: 1, kind: input, shape index: {}]   ;;  %s442_s2 = inlined_call_operand.vmem [shape: bf16[2,8,256], index: 2, kind: output, shape index: {}]  }
   0x1   :  { %s408_s11 = smov 0  }
   0x2 LB: > { %s24_s12 = sadd.s32 1, %s383_s10  ;;  %p320_p0 = scmp.ge.s32.totalorder %s387_s11, 1  ;;  %s387_s11 = sphi %s408_s11, %s12_s11   ;;  %s383_s10 = sphi %s406_s10, %s444_s10   ;;  %s379_s9 = sphi %s404_s9, %s443_s9  }
   0x3   : > { %p26_p1 = scmp.ge.s32.totalorder %s24_s12, 2  ;;  %p133_p2 = scmp.lt.s32.totalorder %s387_s11, 3 }
   0x5   : > { %s446_s12 = smov (%p26_p1, %s24_s12), 0  ;;  %p134_p3 = pnand %p320_p0, %p133_p2 }
   0x6   : > { %p164_p4 = scmp.lt.s32.totalorder (!%p134_p3), %s379_s9, 1 }
   0x7   : > { %137 = sbr.rel (%p134_p3) target bundleno = 156 (0x9c), region = 28 }
   0xc   : > { %s448_s9 = smov (!%p164_p4, %s379_s9), 1  ;;  %v184_v6 = vld [vmem:[%s441_s1] sm:$0xf]  ;;  %vm197_vm0 = vcmask 130048  }
   0xd   : > { %s337_s13 = sshll.u32 %s448_s9, 4  ;;  %s338_s19 = sshll.u32 %s448_s9, 3 }
   0xe   : > { %s171_s16 = scalar_lea.vmem %s440_s0, %s337_s13  ;;  %s181_s22 = scalar_lea.vmem %s442_s2, %s338_s19 }
   0xf   : > { %v327_v0 = vld [vmem:[%s171_s16] sm:$0xf]  ;;  %v340_v1 = vld [vmem:[%s171_s16 + $0x4] sm:$0xf0]  ;;  %v339_v2 = vld [vmem:[%s171_s16 + $0x4] sm:$0xf] }
  0x10   : > { %v328_v3 = vor.u32 %v340_v1, %v327_v0  ;;  %v329_v4 = vld [vmem:[%s171_s16 + $0x8] sm:$0xf0] }
  0x11   : > { %v332_v5 = vor.u32 %v339_v2, %v329_v4 }
  0x12   : > { %208 = vmatpush.bf16.msra.mxu0 %v328_v3 }
  0x13   : > { %221 = vmatpush.bf16.msra.mxu1 %v332_v5 }
  0x15   : > { %333 = vmatmul.msk.bf16.vlgmr.msra.gmra.mxu0 %vm197_vm0, %v184_v6 }
  0x16   : > { %334 = vmatmul.msk.bf16.vlgmr.msra.gmra.mxu1 %vm197_vm0, %v184_v6 }
  0x92   : > { %v210_v7 = vpop.f32.mrf.mxu0 }
  0x93   : > { %v223_v8 = vpop.f32.mrf.mxu1 }
  0x94   : > { %v227_v9 = vpack.c.bf16 %v223_v8, %v210_v7 }
  0x96   : > { %228 = vst [vmem:[%s181_s22] sm:$0xff] %v227_v9 }
  0x9a   : > { %v212_v10 = vpop.f32.mrf.mxu0 }
  0x9b   : > { %v225_v11 = vpop.f32.mrf.mxu1 }
  0x9c PF: > { %s12_s11 = sadd.s32 1, %s387_s11   ;;  %s443_s9 = smov %s383_s10 }
  0x9d   : > { %p9_p5 = scmp.ge.s32.totalorder %s12_s11, 4   ;;  %s444_s10 = smov %s446_s12 }
  0x9f   :  { %11 = sbr.rel (!%p9_p5) target bundleno = 2 (0x2), region = 58 }

// kernel: upsample_forward.5
= control target key start
LH: loop header
LB: loop body
LE: loop exit
PB: predicated region body
PF: predicated region fallthrough
CT: control target
= control target key end

     0   :  { %s1102_s12 = smov 0   ;;  %s1104_s13 = smov 0   ;;  %s1246_s0 = inlined_call_operand.vmem [shape: bf16[2,8,16,16], index: 0, kind: input, shape index: {}]   ;;  %s1247_s1 = inlined_call_operand.vmem [shape: bf16[32,16], index: 1, kind: input, shape index: {}]   ;;  %s1248_s2 = inlined_call_operand.vmem [shape: bf16[16,32], index: 2, kind: input, shape index: {}]   ;;  %s1249_s3 = inlined_call_operand.vmem [shape: bf16[2,8,32,32], index: 3, kind: output, shape index: {}]  }
   0x1   :  { %s1106_s14 = smov 0  }
   0x2 LB: > { %s25_s15 = sadd.s32 1, %s1076_s13  ;;  %p938_p0 = scmp.ge.s32.totalorder %s1080_s14, 1  ;;  %s1080_s14 = sphi %s1106_s14, %s13_s14   ;;  %s1076_s13 = sphi %s1104_s13, %s1251_s13   ;;  %s1072_s12 = sphi %s1102_s12, %s1250_s12  }
   0x3   : > { %p27_p1 = scmp.ge.s32.totalorder %s25_s15, 2  ;;  %p159_p2 = scmp.lt.s32.totalorder %s1080_s14, 3 }
   0x5   : > { %s1253_s15 = smov (%p27_p1, %s25_s15), 0  ;;  %p160_p3 = pnand %p938_p0, %p159_p2 }
   0x6   : > { %p194_p4 = scmp.lt.s32.totalorder (!%p160_p3), %s1072_s12, 1 }
   0x7   : > { %163 = sbr.rel (%p160_p3) target bundleno = 358 (0x166), region = 32 }
   0xc   : > { %s1255_s12 = smov (!%p194_p4, %s1072_s12), 1  ;;  %v1031_v0 = vld [vmem:[%s1247_s1] sm:$0xff]  ;;  %vm254_vm0 = vcmask 130048   ;;  %v1032_v9 = vld [vmem:[%s1247_s1 + $0x8] sm:$0xff]  ;;  %vm805_vm1 = vcmask 257024  }
   0xd   : > { %s1021_s16 = sshll.u32 %s1255_s12, 6  ;;  %v1033_v10 = vld [vmem:[%s1248_s2] sm:$0xff]  ;;  %s1022_s26 = sshll.u32 %s1255_s12, 7 }
   0xe   : > { %s202_s19 = scalar_lea.vmem %s1246_s0, %s1021_s16  ;;  %s1171_s29 = scalar_lea.vmem %s1249_s3, %s1022_s26 }
   0xf   : > { %v1023_v1 = vld [vmem:[%s202_s19] sm:$0xff]  ;;  %v1024_v2 = vld [vmem:[%s202_s19 + $0x8] sm:$0xff]  ;;  %v1025_v3 = vld [vmem:[%s202_s19 + $0x10] sm:$0xff] }
  0x10   : > { %v1026_v4 = vld [vmem:[%s202_s19 + $0x18] sm:$0xff]  ;;  %v1029_v5 = vld [vmem:[%s202_s19 + $0x30] sm:$0xff]  ;;  %268 = vmatpush.bf16.msra.mxu0 %v1023_v1  ;;  %293 = vmatpush.bf16.msra.mxu1 %v1024_v2  ;;  %v1027_v7 = vld [vmem:[%s202_s19 + $0x20] sm:$0xff] }
  0x11   : > { %v1030_v6 = vld [vmem:[%s202_s19 + $0x38] sm:$0xff]  ;;  %318 = vmatpush.bf16.msra.mxu2 %v1025_v3  ;;  %343 = vmatpush.bf16.msra.mxu3 %v1026_v4  ;;  %v1028_v8 = vld [vmem:[%s202_s19 + $0x28] sm:$0xff] }
  0x13   : > { %955 = vmatmul.msk.bf16.vlgmr.msra.gmra.mxu0 %vm254_vm0, %v1031_v0  ;;  %961 = vmatmul.msk.bf16.vlgmr.msra.gmra.mxu1 %vm254_vm0, %v1031_v0 }
  0x14   : > { %967 = vmatmul.msk.bf16.vlgmr.msra.gmra.mxu2 %vm254_vm0, %v1031_v0  ;;  %973 = vmatmul.msk.bf16.vlgmr.msra.gmra.mxu3 %vm254_vm0, %v1031_v0 }
  0x15   : > { %418 = vmatpush.bf16.msrb.mxu2 %v1029_v5  ;;  %443 = vmatpush.bf16.msrb.mxu3 %v1030_v6 }
  0x16   : > { %368 = vmatpush.bf16.msrb.mxu0 %v1027_v7  ;;  %393 = vmatpush.bf16.msrb.mxu1 %v1028_v8 }
  0x19   : > { %586 = vmatpush.bf16.msra.mxu2 %v1033_v10  ;;  %621 = vmatpush.bf16.msra.mxu3 %v1033_v10 }
  0x1a   : > { %516 = vmatpush.bf16.msra.mxu0 %v1033_v10  ;;  %551 = vmatpush.bf16.msra.mxu1 %v1033_v10 }
  0x23   : > { %956 = vmatmul.msk.bf16.gmra.mxu0 %vm254_vm0, %v1032_v9  ;;  %962 = vmatmul.msk.bf16.gmra.mxu1 %vm254_vm0, %v1032_v9 }
  0x24   : > { %968 = vmatmul.msk.bf16.gmra.mxu2 %vm254_vm0, %v1032_v9  ;;  %974 = vmatmul.msk.bf16.gmra.mxu3 %vm254_vm0, %v1032_v9 }
  0x33   : > { %979 = vmatmul.msk.bf16.vlgmr.msrb.gmra.mxu0 %vm254_vm0, %v1031_v0  ;;  %985 = vmatmul.msk.bf16.vlgmr.msrb.gmra.mxu1 %vm254_vm0, %v1031_v0 }
  0x34   : > { %991 = vmatmul.msk.bf16.vlgmr.msrb.gmra.mxu2 %vm254_vm0, %v1031_v0  ;;  %997 = vmatmul.msk.bf16.vlgmr.msrb.gmra.mxu3 %vm254_vm0, %v1031_v0 }
  0x35   : > { %726 = vmatpush.bf16.msrb.mxu2 %v1033_v10  ;;  %761 = vmatpush.bf16.msrb.mxu3 %v1033_v10 }
  0x36   : > { %656 = vmatpush.bf16.msrb.mxu0 %v1033_v10  ;;  %691 = vmatpush.bf16.msrb.mxu1 %v1033_v10 }
  0x43   : > { %980 = vmatmul.msk.bf16.gmra.mxu0 %vm254_vm0, %v1032_v9  ;;  %986 = vmatmul.msk.bf16.gmra.mxu1 %vm254_vm0, %v1032_v9 }
  0x44   : > { %992 = vmatmul.msk.bf16.gmra.mxu2 %vm254_vm0, %v1032_v9  ;;  %998 = vmatmul.msk.bf16.gmra.mxu3 %vm254_vm0, %v1032_v9 }
  0x90   : > { %v270_v11 = vpop.f32.mrf.mxu0  ;;  %v295_v12 = vpop.f32.mrf.mxu1 }
  0x91   : > { %v455_v13 = vpack.c.bf16 %v270_v11, %v270_v11  ;;  %v459_v14 = vpack.c.bf16 %v295_v12, %v295_v12 }
  0x93   : > { %v491_v19 = vunpack.c.l.b16 %v455_v13  ;;  %v532_v20 = vunpack.c.l.b16 %v459_v14 }
  0x97   : > { %v320_v15 = vpop.f32.mrf.mxu2  ;;  %v345_v16 = vpop.f32.mrf.mxu3 }
  0x98   : > { %v272_v17 = vpop.f32.mrf.mxu0  ;;  %v297_v18 = vpop.f32.mrf.mxu1  ;;  %v463_v27 = vpack.c.bf16 %v320_v15, %v320_v15  ;;  %v467_v28 = vpack.c.bf16 %v345_v16, %v345_v16 }
  0x99   : > { %v456_v21 = vpack.c.bf16 %v272_v17, %v272_v17  ;;  %v460_v22 = vpack.c.bf16 %v297_v18, %v297_v18 }
  0x9a   : > { %v567_v35 = vunpack.c.l.b16 %v463_v27  ;;  %v602_v36 = vunpack.c.l.b16 %v467_v28 }
  0x9b   : > { %v492_v23 = vunpack.c.l.b16 %v456_v21  ;;  %v533_v24 = vunpack.c.l.b16 %v460_v22 }
  0x9d   : > { %v495_v25 = vpack.c.b16 %v492_v23, %v491_v19  ;;  %v536_v26 = vpack.c.b16 %v533_v24, %v532_v20 }
  0x9f   : > { %v322_v29 = vpop.f32.mrf.mxu2  ;;  %v347_v30 = vpop.f32.mrf.mxu3  ;;  %1003 = vmatmul.msk.bf16.vlgmr.msra.gmra.mxu0 %vm254_vm0, %v495_v25  ;;  %1005 = vmatmul.msk.bf16.vlgmr.msra.gmra.mxu1 %vm254_vm0, %v536_v26 }
  0xa0   : > { %v464_v31 = vpack.c.bf16 %v322_v29, %v322_v29  ;;  %v468_v32 = vpack.c.bf16 %v347_v30, %v347_v30  ;;  %v275_v33 = vpop.f32.mrf.mxu0  ;;  %v300_v34 = vpop.f32.mrf.mxu1 }
  0xa1   : > { %v457_v41 = vpack.c.bf16 %v275_v33, %v275_v33  ;;  %v461_v42 = vpack.c.bf16 %v300_v34, %v300_v34 }
  0xa2   : > { %v568_v37 = vunpack.c.l.b16 %v464_v31  ;;  %v603_v38 = vunpack.c.l.b16 %v468_v32 }
  0xa3   : > { %v493_v47 = vunpack.c.l.b16 %v457_v41  ;;  %v534_v48 = vunpack.c.l.b16 %v461_v42 }
  0xa4   : > { %v571_v39 = vpack.c.b16 %v568_v37, %v567_v35  ;;  %v606_v40 = vpack.c.b16 %v603_v38, %v602_v36 }
  0xa6   : > { %1007 = vmatmul.msk.bf16.vlgmr.msra.gmra.mxu2 %vm254_vm0, %v571_v39  ;;  %1009 = vmatmul.msk.bf16.vlgmr.msra.gmra.mxu3 %vm254_vm0, %v606_v40 }
  0xa7   : > { %v325_v43 = vpop.f32.mrf.mxu2  ;;  %v350_v44 = vpop.f32.mrf.mxu3 }
  0xa8   : > { %v277_v45 = vpop.f32.mrf.mxu0  ;;  %v302_v46 = vpop.f32.mrf.mxu1  ;;  %v465_v55 = vpack.c.bf16 %v325_v43, %v325_v43  ;;  %v469_v56 = vpack.c.bf16 %v350_v44, %v350_v44 }
  0xa9   : > { %v458_v49 = vpack.c.bf16 %v277_v45, %v277_v45  ;;  %v462_v50 = vpack.c.bf16 %v302_v46, %v302_v46 }
  0xaa   : > { %v569_v63 = vunpack.c.l.b16 %v465_v55  ;;  %v604_v0 = vunpack.c.l.b16 %v469_v56 }
  0xab   : > { %v494_v51 = vunpack.c.l.b16 %v458_v49  ;;  %v535_v52 = vunpack.c.l.b16 %v462_v50 }
  0xad   : > { %v496_v53 = vpack.c.b16 %v494_v51, %v493_v47  ;;  %v537_v54 = vpack.c.b16 %v535_v52, %v534_v48 }
  0xaf   : > { %v327_v57 = vpop.f32.mrf.mxu2  ;;  %v352_v58 = vpop.f32.mrf.mxu3  ;;  %1004 = vmatmul.msk.bf16.gmra.mxu0 %vm254_vm0, %v496_v53  ;;  %1006 = vmatmul.msk.bf16.gmra.mxu1 %vm254_vm0, %v537_v54 }
  0xb0   : > { %v466_v59 = vpack.c.bf16 %v327_v57, %v327_v57  ;;  %v470_v60 = vpack.c.bf16 %v352_v58, %v352_v58  ;;  %v370_v61 = vpop.f32.mrf.mxu0  ;;  %v395_v62 = vpop.f32.mrf.mxu1 }
  0xb1   : > { %v471_v5 = vpack.c.bf16 %v370_v61, %v370_v61  ;;  %v475_v6 = vpack.c.bf16 %v395_v62, %v395_v62 }
  0xb2   : > { %v570_v1 = vunpack.c.l.b16 %v466_v59  ;;  %v605_v2 = vunpack.c.l.b16 %v470_v60 }
  0xb3   : > { %v637_v11 = vunpack.c.l.b16 %v471_v5  ;;  %v672_v12 = vunpack.c.l.b16 %v475_v6 }
  0xb4   : > { %v572_v3 = vpack.c.b16 %v570_v1, %v569_v63  ;;  %v607_v4 = vpack.c.b16 %v605_v2, %v604_v0 }
  0xb6   : > { %1008 = vmatmul.msk.bf16.gmra.mxu2 %vm254_vm0, %v572_v3  ;;  %1010 = vmatmul.msk.bf16.gmra.mxu3 %vm254_vm0, %v607_v4 }
  0xb7   : > { %v420_v7 = vpop.f32.mrf.mxu2  ;;  %v445_v8 = vpop.f32.mrf.mxu3 }
  0xb8   : > { %v372_v9 = vpop.f32.mrf.mxu0  ;;  %v397_v10 = vpop.f32.mrf.mxu1  ;;  %v479_v19 = vpack.c.bf16 %v420_v7, %v420_v7  ;;  %v483_v20 = vpack.c.bf16 %v445_v8, %v445_v8 }
  0xb9   : > { %v472_v13 = vpack.c.bf16 %v372_v9, %v372_v9  ;;  %v476_v14 = vpack.c.bf16 %v397_v10, %v397_v10 }
  0xba   : > { %v707_v27 = vunpack.c.l.b16 %v479_v19  ;;  %v742_v28 = vunpack.c.l.b16 %v483_v20 }
  0xbb   : > { %v638_v15 = vunpack.c.l.b16 %v472_v13  ;;  %v673_v16 = vunpack.c.l.b16 %v476_v14 }
  0xbd   : > { %v641_v17 = vpack.c.b16 %v638_v15, %v637_v11  ;;  %v676_v18 = vpack.c.b16 %v673_v16, %v672_v12 }
  0xbf   : > { %v422_v21 = vpop.f32.mrf.mxu2  ;;  %v447_v22 = vpop.f32.mrf.mxu3  ;;  %1011 = vmatmul.msk.bf16.vlgmr.msrb.gmra.mxu0 %vm254_vm0, %v641_v17  ;;  %1013 = vmatmul.msk.bf16.vlgmr.msrb.gmra.mxu1 %vm254_vm0, %v676_v18 }
  0xc0   : > { %v480_v23 = vpack.c.bf16 %v422_v21, %v422_v21  ;;  %v484_v24 = vpack.c.bf16 %v447_v22, %v447_v22  ;;  %v375_v25 = vpop.f32.mrf.mxu0  ;;  %v400_v26 = vpop.f32.mrf.mxu1 }
  0xc1   : > { %v473_v33 = vpack.c.bf16 %v375_v25, %v375_v25  ;;  %v477_v34 = vpack.c.bf16 %v400_v26, %v400_v26 }
  0xc2   : > { %v708_v29 = vunpack.c.l.b16 %v480_v23  ;;  %v743_v30 = vunpack.c.l.b16 %v484_v24 }
  0xc3   : > { %v639_v39 = vunpack.c.l.b16 %v473_v33  ;;  %v674_v40 = vunpack.c.l.b16 %v477_v34 }
  0xc4   : > { %v711_v31 = vpack.c.b16 %v708_v29, %v707_v27  ;;  %v746_v32 = vpack.c.b16 %v743_v30, %v742_v28 }
  0xc6   : > { %1015 = vmatmul.msk.bf16.vlgmr.msrb.gmra.mxu2 %vm254_vm0, %v711_v31  ;;  %1017 = vmatmul.msk.bf16.vlgmr.msrb.gmra.mxu3 %vm254_vm0, %v746_v32 }
  0xc7   : > { %v425_v35 = vpop.f32.mrf.mxu2  ;;  %v450_v36 = vpop.f32.mrf.mxu3 }
  0xc8   : > { %v377_v37 = vpop.f32.mrf.mxu0  ;;  %v402_v38 = vpop.f32.mrf.mxu1  ;;  %v481_v47 = vpack.c.bf16 %v425_v35, %v425_v35  ;;  %v485_v48 = vpack.c.bf16 %v450_v36, %v450_v36 }
  0xc9   : > { %v474_v41 = vpack.c.bf16 %v377_v37, %v377_v37  ;;  %v478_v42 = vpack.c.bf16 %v402_v38, %v402_v38 }
  0xca   : > { %v709_v53 = vunpack.c.l.b16 %v481_v47  ;;  %v744_v54 = vunpack.c.l.b16 %v485_v48 }
  0xcb   : > { %v640_v43 = vunpack.c.l.b16 %v474_v41  ;;  %v675_v44 = vunpack.c.l.b16 %v478_v42 }
  0xcd   : > { %v642_v45 = vpack.c.b16 %v640_v43, %v639_v39  ;;  %v677_v46 = vpack.c.b16 %v675_v44, %v674_v40 }
  0xcf   : > { %v427_v49 = vpop.f32.mrf.mxu2  ;;  %v452_v50 = vpop.f32.mrf.mxu3  ;;  %1012 = vmatmul.msk.bf16.gmra.mxu0 %vm254_vm0, %v642_v45  ;;  %1014 = vmatmul.msk.bf16.gmra.mxu1 %vm254_vm0, %v677_v46 }
  0xd0   : > { %v482_v51 = vpack.c.bf16 %v427_v49, %v427_v49  ;;  %v486_v52 = vpack.c.bf16 %v452_v50, %v452_v50 }
  0xd2   : > { %v710_v55 = vunpack.c.l.b16 %v482_v51  ;;  %v745_v56 = vunpack.c.l.b16 %v486_v52 }
  0xd4   : > { %v712_v57 = vpack.c.b16 %v710_v55, %v709_v53  ;;  %v747_v58 = vpack.c.b16 %v745_v56, %v744_v54 }
  0xd6   : > { %1016 = vmatmul.msk.bf16.gmra.mxu2 %vm254_vm0, %v712_v57  ;;  %1018 = vmatmul.msk.bf16.gmra.mxu3 %vm254_vm0, %v747_v58 }
 0x11c   : > { %v518_v59 = vpop.f32.mrf.mxu0  ;;  %v553_v60 = vpop.f32.mrf.mxu1 }
 0x11d   : > { %v773_v61 = vpack.c.bf16 %v518_v59, %v518_v59  ;;  %v777_v62 = vpack.c.bf16 %v553_v60, %v553_v60 }
 0x11f   : > { %806 = vst.msk [vmem:[%s1171_s29] sm:$0xf] %vm805_vm1, %v773_v61 }
 0x120   : > { %810 = vst.msk [vmem:[%s1171_s29 + $0x10] sm:$0xf] %vm805_vm1, %v777_v62 }
 0x124   : > { %v520_v63 = vpop.f32.mrf.mxu0  ;;  %v555_v0 = vpop.f32.mrf.mxu1 }
 0x125   : > { %v774_v1 = vpack.c.bf16 %v520_v63, %v520_v63  ;;  %v778_v2 = vpack.c.bf16 %v555_v0, %v555_v0 }
 0x127   : > { %807 = vst.msk [vmem:[%s1171_s29 + $0x4] sm:$0xf] %vm805_vm1, %v774_v1 }
 0x128   : > { %811 = vst.msk [vmem:[%s1171_s29 + $0x14] sm:$0xf] %vm805_vm1, %v778_v2 }
 0x129   : > { %v588_v3 = vpop.f32.mrf.mxu2  ;;  %v623_v4 = vpop.f32.mrf.mxu3 }
 0x12a   : > { %v781_v5 = vpack.c.bf16 %v588_v3, %v588_v3  ;;  %v785_v6 = vpack.c.bf16 %v623_v4, %v623_v4 }
 0x12c   : > { %814 = vst.msk [vmem:[%s1171_s29 + $0x20] sm:$0xf] %vm805_vm1, %v781_v5  ;;  %v523_v7 = vpop.f32.mrf.mxu0  ;;  %v558_v8 = vpop.f32.mrf.mxu1 }
 0x12d   : > { %818 = vst.msk [vmem:[%s1171_s29 + $0x30] sm:$0xf] %vm805_vm1, %v785_v6  ;;  %v775_v9 = vpack.c.bf16 %v523_v7, %v523_v7  ;;  %v779_v10 = vpack.c.bf16 %v558_v8, %v558_v8 }
 0x12f   : > { %808 = vst.msk [vmem:[%s1171_s29 + $0x8] sm:$0xf] %vm805_vm1, %v775_v9 }
 0x130   : > { %812 = vst.msk [vmem:[%s1171_s29 + $0x18] sm:$0xf] %vm805_vm1, %v779_v10 }
 0x131   : > { %v590_v11 = vpop.f32.mrf.mxu2  ;;  %v625_v12 = vpop.f32.mrf.mxu3 }
 0x132   : > { %v782_v13 = vpack.c.bf16 %v590_v11, %v590_v11  ;;  %v786_v14 = vpack.c.bf16 %v625_v12, %v625_v12 }
 0x134   : > { %815 = vst.msk [vmem:[%s1171_s29 + $0x24] sm:$0xf] %vm805_vm1, %v782_v13  ;;  %v525_v15 = vpop.f32.mrf.mxu0  ;;  %v560_v16 = vpop.f32.mrf.mxu1 }
 0x135   : > { %819 = vst.msk [vmem:[%s1171_s29 + $0x34] sm:$0xf] %vm805_vm1, %v786_v14  ;;  %v776_v17 = vpack.c.bf16 %v525_v15, %v525_v15  ;;  %v780_v18 = vpack.c.bf16 %v560_v16, %v560_v16 }
 0x137   : > { %809 = vst.msk [vmem:[%s1171_s29 + $0xc] sm:$0xf] %vm805_vm1, %v776_v17 }
 0x138   : > { %813 = vst.msk [vmem:[%s1171_s29 + $0x1c] sm:$0xf] %vm805_vm1, %v780_v18 }
 0x139   : > { %v593_v19 = vpop.f32.mrf.mxu2  ;;  %v628_v20 = vpop.f32.mrf.mxu3 }
 0x13a   : > { %v783_v21 = vpack.c.bf16 %v593_v19, %v593_v19  ;;  %v787_v22 = vpack.c.bf16 %v628_v20, %v628_v20 }
 0x13c   : > { %816 = vst.msk [vmem:[%s1171_s29 + $0x28] sm:$0xf] %vm805_vm1, %v783_v21  ;;  %v658_v23 = vpop.f32.mrf.mxu0  ;;  %v693_v24 = vpop.f32.mrf.mxu1 }
 0x13d   : > { %820 = vst.msk [vmem:[%s1171_s29 + $0x38] sm:$0xf] %vm805_vm1, %v787_v22  ;;  %v789_v25 = vpack.c.bf16 %v658_v23, %v658_v23  ;;  %v793_v26 = vpack.c.bf16 %v693_v24, %v693_v24 }
 0x13f   : > { %822 = vst.msk [vmem:[%s1171_s29 + $0x40] sm:$0xf] %vm805_vm1, %v789_v25 }
 0x140   : > { %826 = vst.msk [vmem:[%s1171_s29 + $0x50] sm:$0xf] %vm805_vm1, %v793_v26 }
 0x141   : > { %v595_v27 = vpop.f32.mrf.mxu2  ;;  %v630_v28 = vpop.f32.mrf.mxu3 }
 0x142   : > { %v784_v29 = vpack.c.bf16 %v595_v27, %v595_v27  ;;  %v788_v30 = vpack.c.bf16 %v630_v28, %v630_v28 }
 0x144   : > { %817 = vst.msk [vmem:[%s1171_s29 + $0x2c] sm:$0xf] %vm805_vm1, %v784_v29  ;;  %v660_v31 = vpop.f32.mrf.mxu0  ;;  %v695_v32 = vpop.f32.mrf.mxu1 }
 0x145   : > { %821 = vst.msk [vmem:[%s1171_s29 + $0x3c] sm:$0xf] %vm805_vm1, %v788_v30  ;;  %v790_v33 = vpack.c.bf16 %v660_v31, %v660_v31  ;;  %v794_v34 = vpack.c.bf16 %v695_v32, %v695_v32 }
 0x147   : > { %823 = vst.msk [vmem:[%s1171_s29 + $0x44] sm:$0xf] %vm805_vm1, %v790_v33 }
 0x148   : > { %827 = vst.msk [vmem:[%s1171_s29 + $0x54] sm:$0xf] %vm805_vm1, %v794_v34 }
 0x149   : > { %v728_v35 = vpop.f32.mrf.mxu2  ;;  %v763_v36 = vpop.f32.mrf.mxu3 }
 0x14a   : > { %v797_v37 = vpack.c.bf16 %v728_v35, %v728_v35  ;;  %v801_v38 = vpack.c.bf16 %v763_v36, %v763_v36 }
 0x14c   : > { %830 = vst.msk [vmem:[%s1171_s29 + $0x60] sm:$0xf] %vm805_vm1, %v797_v37  ;;  %v663_v39 = vpop.f32.mrf.mxu0  ;;  %v698_v40 = vpop.f32.mrf.mxu1 }
 0x14d   : > { %834 = vst.msk [vmem:[%s1171_s29 + $0x70] sm:$0xf] %vm805_vm1, %v801_v38  ;;  %v791_v41 = vpack.c.bf16 %v663_v39, %v663_v39  ;;  %v795_v42 = vpack.c.bf16 %v698_v40, %v698_v40 }
 0x14f   : > { %824 = vst.msk [vmem:[%s1171_s29 + $0x48] sm:$0xf] %vm805_vm1, %v791_v41 }
 0x150   : > { %828 = vst.msk [vmem:[%s1171_s29 + $0x58] sm:$0xf] %vm805_vm1, %v795_v42 }
 0x151   : > { %v730_v43 = vpop.f32.mrf.mxu2  ;;  %v765_v44 = vpop.f32.mrf.mxu3 }
 0x152   : > { %v798_v45 = vpack.c.bf16 %v730_v43, %v730_v43  ;;  %v802_v46 = vpack.c.bf16 %v765_v44, %v765_v44 }
 0x154   : > { %831 = vst.msk [vmem:[%s1171_s29 + $0x64] sm:$0xf] %vm805_vm1, %v798_v45  ;;  %v665_v47 = vpop.f32.mrf.mxu0  ;;  %v700_v48 = vpop.f32.mrf.mxu1 }
 0x155   : > { %835 = vst.msk [vmem:[%s1171_s29 + $0x74] sm:$0xf] %vm805_vm1, %v802_v46  ;;  %v792_v49 = vpack.c.bf16 %v665_v47, %v665_v47  ;;  %v796_v50 = vpack.c.bf16 %v700_v48, %v700_v48 }
 0x157   : > { %825 = vst.msk [vmem:[%s1171_s29 + $0x4c] sm:$0xf] %vm805_vm1, %v792_v49 }
 0x158   : > { %829 = vst.msk [vmem:[%s1171_s29 + $0x5c] sm:$0xf] %vm805_vm1, %v796_v50 }
 0x159   : > { %v733_v51 = vpop.f32.mrf.mxu2  ;;  %v768_v52 = vpop.f32.mrf.mxu3 }
 0x15a   : > { %v799_v53 = vpack.c.bf16 %v733_v51, %v733_v51  ;;  %v803_v54 = vpack.c.bf16 %v768_v52, %v768_v52 }
 0x15c   : > { %832 = vst.msk [vmem:[%s1171_s29 + $0x68] sm:$0xf] %vm805_vm1, %v799_v53 }
 0x15d   : > { %836 = vst.msk [vmem:[%s1171_s29 + $0x78] sm:$0xf] %vm805_vm1, %v803_v54 }
 0x161   : > { %v735_v55 = vpop.f32.mrf.mxu2  ;;  %v770_v56 = vpop.f32.mrf.mxu3 }
 0x162   : > { %v800_v57 = vpack.c.bf16 %v735_v55, %v735_v55  ;;  %v804_v58 = vpack.c.bf16 %v770_v56, %v770_v56 }
 0x164   : > { %833 = vst.msk [vmem:[%s1171_s29 + $0x6c] sm:$0xf] %vm805_vm1, %v800_v57 }
 0x165   : > { %837 = vst.msk [vmem:[%s1171_s29 + $0x7c] sm:$0xf] %vm805_vm1, %v804_v58 }
 0x166 PF: > { %s13_s14 = sadd.s32 1, %s1080_s14   ;;  %s1250_s12 = smov %s1076_s13 }
 0x167   : > { %p10_p5 = scmp.ge.s32.totalorder %s13_s14, 4   ;;  %s1251_s13 = smov %s1253_s15 }
 0x169   :  { %12 = sbr.rel (!%p10_p5) target bundleno = 2 (0x2), region = 62 }

// kernel: upsample_forward.6
= control target key start
LH: loop header
LB: loop body
LE: loop exit
PB: predicated region body
PF: predicated region fallthrough
CT: control target
= control target key end

     0   :  { %s547_s9 = smov 0   ;;  %s549_s10 = smov 0   ;;  %s609_s0 = inlined_call_operand.vmem [shape: bf16[2,8,1024], index: 0, kind: input, shape index: {}]   ;;  %s610_s1 = inlined_call_operand.vmem [shape: bf16[4,8], index: 1, kind: input, shape index: {}]   ;;  %s611_s2 = inlined_call_operand.vmem [shape: bf16[2,4,1024], index: 2, kind: output, shape index: {}]  }
   0x1   :  { %s551_s11 = smov 0  }
   0x2 LB: > { %s24_s12 = sadd.s32 1, %s526_s10  ;;  %p467_p0 = scmp.ge.s32.totalorder %s530_s11, 1  ;;  %s530_s11 = sphi %s551_s11, %s12_s11   ;;  %s526_s10 = sphi %s549_s10, %s613_s10   ;;  %s522_s9 = sphi %s547_s9, %s612_s9  }
   0x3   : > { %p26_p1 = scmp.ge.s32.totalorder %s24_s12, 2  ;;  %p133_p2 = scmp.lt.s32.totalorder %s530_s11, 3 }
   0x5   : > { %s615_s12 = smov (%p26_p1, %s24_s12), 0  ;;  %p134_p3 = pnand %p467_p0, %p133_p2 }
   0x6   : > { %p164_p4 = scmp.lt.s32.totalorder (!%p134_p3), %s522_s9, 1 }
   0x7   : > { %137 = sbr.rel (%p134_p3) target bundleno = 181 (0xb5), region = 28 }
   0xc   : > { %s617_s9 = smov (!%p164_p4, %s522_s9), 1  ;;  %vm213_vm0 = vcmask 1043456   ;;  %v184_v24 = vld [vmem:[%s610_s1] sm:$0x3]  ;;  %vm209_vm1 = vcmask 64512   ;;  %vm356_vm2 = vcmask 1041408  }
   0xd   : > { %s482_s13 = sshll.u32 %s617_s9, 5  ;;  %s483_s19 = sshll.u32 %s617_s9, 4  ;;  %vm360_vm3 = vcmask 1045508  }
   0xe   : > { %s171_s16 = scalar_lea.vmem %s609_s0, %s482_s13  ;;  %s181_s22 = scalar_lea.vmem %s611_s2, %s483_s19 }
   0xf   : > { %v185_v0 = vld [vmem:[%s171_s16] sm:$0xff]  ;;  %v186_v1 = vld [vmem:[%s171_s16 + $0x8] sm:$0xff]  ;;  %v188_v2 = vld [vmem:[%s171_s16 + $0x18] sm:$0xff] }
  0x10   : > { %v193_v3 = vunpack.c.l.b16 %v185_v0  ;;  %v194_v4 = vunpack.c.h.b16 %v185_v0  ;;  %v195_v5 = vunpack.c.l.b16 %v186_v1  ;;  %v196_v6 = vunpack.c.h.b16 %v186_v1  ;;  %v187_v7 = vld [vmem:[%s171_s16 + $0x10] sm:$0xff] }
  0x11   : > { %v199_v8 = vunpack.c.l.b16 %v188_v2  ;;  %v200_v9 = vunpack.c.h.b16 %v188_v2  ;;  %v197_v10 = vunpack.c.l.b16 %v187_v7  ;;  %v198_v11 = vunpack.c.h.b16 %v187_v7 }
  0x12   : > { %v201_v12 = vpack.c.b16 %v193_v3, %v193_v3  ;;  %v202_v13 = vpack.c.b16 %v194_v4, %v194_v4  ;;  %v203_v14 = vpack.c.b16 %v195_v5, %v195_v5  ;;  %v204_v15 = vpack.c.b16 %v196_v6, %v196_v6 }
  0x13   : > { %v207_v16 = vpack.c.b16 %v199_v8, %v199_v8  ;;  %v208_v17 = vpack.c.b16 %v200_v9, %v200_v9  ;;  %v205_v18 = vpack.c.b16 %v197_v10, %v197_v10  ;;  %v206_v19 = vpack.c.b16 %v198_v11, %v198_v11 }
  0x14   : > { %v215_v20 = vsel %vm213_vm0, %v201_v12, 0  ;;  %v218_v21 = vsel %vm213_vm0, %v202_v13, 0  ;;  %v221_v22 = vsel %vm213_vm0, %v203_v14, 0  ;;  %v224_v23 = vsel %vm213_vm0, %v204_v15, 0 }
  0x15   : > { %245 = vmatpush.bf16.msra.mxu0 %v215_v20  ;;  %258 = vmatpush.bf16.msra.mxu1 %v218_v21  ;;  %v233_v25 = vsel %vm213_vm0, %v207_v16, 0  ;;  %v236_v26 = vsel %vm213_vm0, %v208_v17, 0  ;;  %v227_v27 = vsel %vm213_vm0, %v205_v18, 0  ;;  %v230_v28 = vsel %vm213_vm0, %v206_v19, 0 }
  0x16   : > { %271 = vmatpush.bf16.msra.mxu2 %v221_v22  ;;  %284 = vmatpush.bf16.msra.mxu3 %v224_v23 }
  0x18   : > { %472 = vmatmul.msk.bf16.vlgmr.msra.gmra.mxu0 %vm209_vm1, %v184_v24  ;;  %473 = vmatmul.msk.bf16.vlgmr.msra.gmra.mxu1 %vm209_vm1, %v184_v24 }
  0x19   : > { %474 = vmatmul.msk.bf16.vlgmr.msra.gmra.mxu2 %vm209_vm1, %v184_v24  ;;  %475 = vmatmul.msk.bf16.vlgmr.msra.gmra.mxu3 %vm209_vm1, %v184_v24 }
  0x1a   : > { %323 = vmatpush.bf16.msrb.mxu2 %v233_v25  ;;  %336 = vmatpush.bf16.msrb.mxu3 %v236_v26 }
  0x1b   : > { %297 = vmatpush.bf16.msrb.mxu0 %v227_v27  ;;  %310 = vmatpush.bf16.msrb.mxu1 %v230_v28 }
  0x28   : > { %476 = vmatmul.msk.bf16.vlgmr.msrb.gmra.mxu0 %vm209_vm1, %v184_v24  ;;  %477 = vmatmul.msk.bf16.vlgmr.msrb.gmra.mxu1 %vm209_vm1, %v184_v24 }
  0x29   : > { %478 = vmatmul.msk.bf16.vlgmr.msrb.gmra.mxu2 %vm209_vm1, %v184_v24  ;;  %479 = vmatmul.msk.bf16.vlgmr.msrb.gmra.mxu3 %vm209_vm1, %v184_v24 }
  0x95   : > { %v247_v29 = vpop.f32.mrf.mxu0  ;;  %v260_v30 = vpop.f32.mrf.mxu1 }
  0x96   : > { %v342_v31 = vpack.c.bf16 %v260_v30, %v247_v29 }
  0x98   : > { %v350_v34 = vrot.slane %v342_v31, 2 }
  0x9a   : > { %v359_v40 = vsel %vm356_vm2, %v342_v31, %v350_v34 }
  0x9c   : > { %v273_v32 = vpop.f32.mrf.mxu2  ;;  %v286_v33 = vpop.f32.mrf.mxu3 }
  0x9d   : > { %v343_v35 = vpack.c.bf16 %v286_v33, %v273_v32  ;;  %v249_v36 = vpop.f32.mrf.mxu0  ;;  %v262_v37 = vpop.f32.mrf.mxu1 }
  0x9f   : > { %v351_v38 = vrot.slane %v343_v35, 4  ;;  %v352_v39 = vrot.slane %v343_v35, 6 }
  0xa1   : > { %v363_v41 = vsel %vm360_vm3, %v351_v38, %v352_v39 }
  0xa2   : > { %v364_v42 = vsel %vm213_vm0, %v359_v40, %v363_v41 }
  0xa3   : > { %374 = vst [vmem:[%s181_s22] sm:$0xff] %v364_v42 }
  0xa4   : > { %v275_v43 = vpop.f32.mrf.mxu2  ;;  %v288_v44 = vpop.f32.mrf.mxu3 }
  0xa5   : > { %v299_v45 = vpop.f32.mrf.mxu0  ;;  %v312_v46 = vpop.f32.mrf.mxu1 }
  0xa6   : > { %v344_v47 = vpack.c.bf16 %v312_v46, %v299_v45 }
  0xa8   : > { %v353_v50 = vrot.slane %v344_v47, 2 }
  0xaa   : > { %v367_v56 = vsel %vm356_vm2, %v344_v47, %v353_v50 }
  0xac   : > { %v325_v48 = vpop.f32.mrf.mxu2  ;;  %v338_v49 = vpop.f32.mrf.mxu3 }
  0xad   : > { %v345_v51 = vpack.c.bf16 %v338_v49, %v325_v48  ;;  %v301_v52 = vpop.f32.mrf.mxu0  ;;  %v314_v53 = vpop.f32.mrf.mxu1 }
  0xaf   : > { %v354_v54 = vrot.slane %v345_v51, 4  ;;  %v355_v55 = vrot.slane %v345_v51, 6 }
  0xb1   : > { %v370_v57 = vsel %vm360_vm3, %v354_v54, %v355_v55 }
  0xb2   : > { %v371_v58 = vsel %vm213_vm0, %v367_v56, %v370_v57 }
  0xb3   : > { %375 = vst [vmem:[%s181_s22 + $0x8] sm:$0xff] %v371_v58 }
  0xb4   : > { %v327_v59 = vpop.f32.mrf.mxu2  ;;  %v340_v60 = vpop.f32.mrf.mxu3 }
  0xb5 PF: > { %s12_s11 = sadd.s32 1, %s530_s11   ;;  %s612_s9 = smov %s526_s10 }
  0xb6   : > { %p9_p5 = scmp.ge.s32.totalorder %s12_s11, 4   ;;  %s613_s10 = smov %s615_s12 }
  0xb8   :  { %11 = sbr.rel (!%p9_p5) target bundleno = 2 (0x2), region = 58 }

// kernel: upsample_forward.7
= control target key start
LH: loop header
LB: loop body
LE: loop exit
PB: predicated region body
PF: predicated region fallthrough
CT: control target
= control target key end

     0   :  { %8 = vsyncpa [#allocation3], 0  ;;  %s1345_s0 = inlined_call_operand.vmem [shape: bf16[2,4,32,32], index: 0, kind: input, shape index: {}]   ;;  %s1346_s1 = inlined_call_operand.vmem [shape: bf16[64,32], index: 1, kind: input, shape index: {}]   ;;  %s1347_s2 = inlined_call_operand.vmem [shape: bf16[32,64], index: 2, kind: input, shape index: {}]   ;;  %s1348_s3 = inlined_call_operand.hbm [shape: f32[2,4,64,64], index: 3, kind: output, shape index: {}]  }
   0x1   :  { %10 = vsyncpa [#allocation3 + $0x1], 0  ;;  %s1127_s12 = smov 0   ;;  %s1129_s13 = smov 0  }
   0x2   :  { %s1131_s14 = smov 0   ;;  %s1133_s15 = smov 0  }
   0x3   :  { %s1135_s16 = smov 0   ;;  %s1137_s17 = smov 0  }
   0x4 LB: > { %s851_s18 = sadd.s32 4294967295, %s1103_s17   ;;  %s852_s19 = sadd.s32 4294967294, %s1103_s17   ;;  %s1103_s17 = sphi %s1137_s17, %s16_s17   ;;  %s1099_s16 = sphi %s1135_s16, %s1355_s16   ;;  %s1095_s15 = sphi %s1133_s15, %s1354_s15   ;;  %s1091_s14 = sphi %s1131_s14, %s1353_s14   ;;  %s1087_s13 = sphi %s1129_s13, %s1352_s13   ;;  %s1083_s12 = sphi %s1127_s12, %s1351_s12  }
   0x5   : > { %s28_s20 = sadd.s32 1, %s1099_s16  ;;  %s107_s21 = sadd.s32 1, %s1091_s14 }
   0x6   : > { %p30_p0 = scmp.ge.s32.totalorder %s28_s20, 2  ;;  %p117_p1 = scmp.ne.s32.totalorder %s1091_s14, %s1087_s13 }
   0x7   : > { %p118_p2 = scmp.eq.s32.totalorder %s851_s18, 1  ;;  %p123_p3 = scmp.ne.s32.totalorder %s1087_s13, %s1083_s12 }
   0x8   : > { %s1357_s20 = smov (%p30_p0, %s28_s20), 0  ;;  %p124_p5 = scmp.eq.s32.totalorder %s852_s19, 1 }
   0x9   : > { %p1167_p4 = por %p118_p2, %p117_p1  ;;  %s102_s23 = ssub.s32 %s1099_s16, %s1357_s20 }
   0xa   : > { %p855_p6 = scmp.ge.s32.totalorder %s1103_s17, 1  ;;  %p105_p7 = scmp.eq.s32.totalorder %s102_s23, 0 }
   0xb   : > { %p1174_p8 = por %p124_p5, %p123_p3  ;;  %p162_p9 = scmp.lt.s32.totalorder %s1103_s17, 3 }
   0xc   : > { %s1180_s25 = scalar_select %p105_p7, %s1091_s14, %s107_s21  }
   0xd   : > { %p163_p10 = pnand %p855_p6, %p162_p9 }
   0xe   : > { %p192_p11 = scmp.lt.s32.totalorder (!%p163_p10), %s1095_s15, 1  ;;  %s967_s29 = sshll.u32 (!%p163_p10), %s1095_s15, 8 }
   0xf   : > { %166 = sbr.rel (%p163_p10) target bundleno = 372 (0x174), region = 32  ;;  %s765_s5 = scalar_lea.hbm (!%p163_p10), %s1348_s3, %s967_s29 }
  0x10   : > { %s768_s7 = sshll.u32 (!%p163_p10), %s765_s5, 4  ;;  %s1045_s18 = scalar_lea.hbm (!%p163_p10), %s1348_s3, 512  ;;  %s769_s7 = int_to_ptr.hbm [resolvable:$true] %s768_s7 }
  0x11   : > { %s1039_s8 = sshra.s32 (!%p163_p10), %s769_s7, 4  ;;  %s1040_s8 = int_to_ptr.hbm [resolvable:$true] %s1039_s8 }
  0x12   : > { %s1041_s9 = scalar_lea.hbm (!%p163_p10), %s1040_s8, 256  ;;  %p1046_p1 = scmp.lt.s32.totalorder (!%p163_p10), %s1040_s8, %s1348_s3 }
  0x13   : > { %p1042_p12 = scmp.ne.s32.totalorder (!%p163_p10), %s1040_s8, %s1041_s9  ;;  %p1047_p2 = scmp.lt.s32.totalorder (!%p163_p10), %s1045_s18, %s1041_s9 }
  0x14   : > { %s193_s26 = scalar_select %p192_p11, %s1095_s15, 1  ;;  %v961_v8 = vld [vmem:[%s1346_s1] sm:$0xff]  ;;  %vm264_vm0 = vcmask 261120   ;;  %v962_v9 = vld [vmem:[%s1346_s1 + $0x8] sm:$0xff]  ;;  %v963_v12 = vld [vmem:[%s1346_s1 + $0x10] sm:$0xff]  ;;  %vm717_vm1 = vcmask 523264  }
  0x15   : > { %v966_v10 = vld [vmem:[%s1347_s2 + $0x8] sm:$0xff]  ;;  %v965_v11 = vld [vmem:[%s1347_s2] sm:$0xff]  ;;  %v964_v13 = vld [vmem:[%s1346_s1 + $0x18] sm:$0xff]  ;;  %p1043_p13 = pnand %p1042_p12, %p1167_p4  ;;  %p1048_p3 = por %p1047_p2, %p1046_p1 }
  0x16   : > { %s952_s27 = sshll.u32 %s193_s26, 6  ;;  %s188_s26 = sand.u32 1, %s1087_s13  }
  0x17   : > { %s200_s30 = scalar_lea.vmem %s1345_s0, %s952_s27  ;;  %s856_s27 = sshll.u32 %s188_s26, 8 }
  0x18   : > { %v954_v0 = vld [vmem:[%s200_s30 + $0x8] sm:$0xff]  ;;  %v956_v1 = vld [vmem:[%s200_s30 + $0x18] sm:$0xff]  ;;  %v953_v4 = vld [vmem:[%s200_s30] sm:$0xff]  ;;  %s1240_s28 = scalar_lea.vmem [#allocation2], %s856_s27  ;;  %s751_s15 = scalar_lea.sflag [#allocation3], %s188_s26 }
  0x19   : > { %v958_v2 = vld [vmem:[%s200_s30 + $0x28] sm:$0xff]  ;;  %v960_v3 = vld [vmem:[%s200_s30 + $0x38] sm:$0xff]  ;;  %283 = vmatpush.bf16.msra.mxu0 %v954_v0  ;;  %324 = vmatpush.bf16.msra.mxu1 %v956_v1  ;;  %v955_v5 = vld [vmem:[%s200_s30 + $0x10] sm:$0xff]  ;;  %s766_s6 = sshll.u32 %s1240_s28, 4  ;;  %p1044_p0 = pneg %p1043_p13  ;;  %s767_s6 = int_to_ptr.vmem [resolvable:$true] %s766_s6 }
  0x1a   : > { %365 = vmatpush.bf16.msra.mxu2 %v958_v2  ;;  %406 = vmatpush.bf16.msra.mxu3 %v960_v3  ;;  %v957_v6 = vld [vmem:[%s200_s30 + $0x20] sm:$0xff]  ;;  %v959_v7 = vld [vmem:[%s200_s30 + $0x30] sm:$0xff] }
  0x1b   : > { %p1049_p5 = pnand %p1048_p3, %p1044_p0 }
  0x1d   : > { %284 = vmatpush.bf16.msra.mxu0 %v953_v4  ;;  %325 = vmatpush.bf16.msra.mxu1 %v955_v5 }
  0x1e   : > { %366 = vmatpush.bf16.msra.mxu2 %v957_v6  ;;  %407 = vmatpush.bf16.msra.mxu3 %v959_v7 }
  0x20   : > { %883 = vmatmul.msk.bf16.vlgmr.msra.gmra.mxu0 %vm264_vm0, %v961_v8  ;;  %895 = vmatmul.msk.bf16.vlgmr.msra.gmra.mxu1 %vm264_vm0, %v961_v8 }
  0x21   : > { %907 = vmatmul.msk.bf16.vlgmr.msra.gmra.mxu2 %vm264_vm0, %v961_v8  ;;  %919 = vmatmul.msk.bf16.vlgmr.msra.gmra.mxu3 %vm264_vm0, %v961_v8 }
  0x22   : > { %633 = vmatpush.bf16.msrb.mxu2 %v966_v10  ;;  %694 = vmatpush.bf16.msrb.mxu3 %v966_v10 }
  0x23   : > { %511 = vmatpush.bf16.msrb.mxu0 %v966_v10  ;;  %572 = vmatpush.bf16.msrb.mxu1 %v966_v10 }
  0x26   : > { %634 = vmatpush.bf16.msrb.mxu2 %v965_v11  ;;  %695 = vmatpush.bf16.msrb.mxu3 %v965_v11 }
  0x27   : > { %512 = vmatpush.bf16.msrb.mxu0 %v965_v11  ;;  %573 = vmatpush.bf16.msrb.mxu1 %v965_v11 }
  0x30   : > { %884 = vmatmul.msk.bf16.gmra.mxu0 %vm264_vm0, %v962_v9  ;;  %896 = vmatmul.msk.bf16.gmra.mxu1 %vm264_vm0, %v962_v9 }
  0x31   : > { %908 = vmatmul.msk.bf16.gmra.mxu2 %vm264_vm0, %v962_v9  ;;  %920 = vmatmul.msk.bf16.gmra.mxu3 %vm264_vm0, %v962_v9 }
  0x40   : > { %885 = vmatmul.msk.bf16.gmra.mxu0 %vm264_vm0, %v963_v12  ;;  %897 = vmatmul.msk.bf16.gmra.mxu1 %vm264_vm0, %v963_v12 }
  0x41   : > { %909 = vmatmul.msk.bf16.gmra.mxu2 %vm264_vm0, %v963_v12  ;;  %921 = vmatmul.msk.bf16.gmra.mxu3 %vm264_vm0, %v963_v12 }
  0x50   : > { %886 = vmatmul.msk.bf16.gmra.mxu0 %vm264_vm0, %v964_v13  ;;  %898 = vmatmul.msk.bf16.gmra.mxu1 %vm264_vm0, %v964_v13 }
  0x51   : > { %910 = vmatmul.msk.bf16.gmra.mxu2 %vm264_vm0, %v964_v13  ;;  %922 = vmatmul.msk.bf16.gmra.mxu3 %vm264_vm0, %v964_v13 }
  0x9d   : > { %v286_v14 = vpop.f32.mrf.mxu0  ;;  %v327_v15 = vpop.f32.mrf.mxu1 }
  0x9e   : > { %v429_v16 = vpack.c.bf16 %v286_v14, %v286_v14  ;;  %v437_v17 = vpack.c.bf16 %v327_v15, %v327_v15 }
  0xa0   : > { %v469_v22 = vunpack.c.l.b16 %v429_v16  ;;  %v542_v23 = vunpack.c.l.b16 %v437_v17 }
  0xa4   : > { %v368_v18 = vpop.f32.mrf.mxu2  ;;  %v409_v19 = vpop.f32.mrf.mxu3 }
  0xa5   : > { %v288_v20 = vpop.f32.mrf.mxu0  ;;  %v329_v21 = vpop.f32.mrf.mxu1  ;;  %v445_v30 = vpack.c.bf16 %v368_v18, %v368_v18  ;;  %v453_v31 = vpack.c.bf16 %v409_v19, %v409_v19 }
  0xa6   : > { %v430_v24 = vpack.c.bf16 %v288_v20, %v288_v20  ;;  %v438_v25 = vpack.c.bf16 %v329_v21, %v329_v21 }
  0xa7   : > { %v603_v38 = vunpack.c.l.b16 %v445_v30  ;;  %v664_v39 = vunpack.c.l.b16 %v453_v31 }
  0xa8   : > { %v470_v26 = vunpack.c.l.b16 %v430_v24  ;;  %v543_v27 = vunpack.c.l.b16 %v438_v25 }
  0xaa   : > { %v477_v28 = vpack.c.b16 %v470_v26, %v469_v22  ;;  %v550_v29 = vpack.c.b16 %v543_v27, %v542_v23 }
  0xac   : > { %v370_v32 = vpop.f32.mrf.mxu2  ;;  %v411_v33 = vpop.f32.mrf.mxu3  ;;  %931 = vmatmul.msk.bf16.vlgmr.msrb.gmra.mxu0 %vm264_vm0, %v477_v28  ;;  %935 = vmatmul.msk.bf16.vlgmr.msrb.gmra.mxu1 %vm264_vm0, %v550_v29 }
  0xad   : > { %v446_v34 = vpack.c.bf16 %v370_v32, %v370_v32  ;;  %v454_v35 = vpack.c.bf16 %v411_v33, %v411_v33  ;;  %v291_v36 = vpop.f32.mrf.mxu0  ;;  %v332_v37 = vpop.f32.mrf.mxu1 }
  0xae   : > { %v431_v44 = vpack.c.bf16 %v291_v36, %v291_v36  ;;  %v439_v45 = vpack.c.bf16 %v332_v37, %v332_v37 }
  0xaf   : > { %v604_v40 = vunpack.c.l.b16 %v446_v34  ;;  %v665_v41 = vunpack.c.l.b16 %v454_v35 }
  0xb0   : > { %v471_v50 = vunpack.c.l.b16 %v431_v44  ;;  %v544_v51 = vunpack.c.l.b16 %v439_v45 }
  0xb1   : > { %v611_v42 = vpack.c.b16 %v604_v40, %v603_v38  ;;  %v672_v43 = vpack.c.b16 %v665_v41, %v664_v39 }
  0xb3   : > { %939 = vmatmul.msk.bf16.vlgmr.msrb.gmra.mxu2 %vm264_vm0, %v611_v42  ;;  %943 = vmatmul.msk.bf16.vlgmr.msrb.gmra.mxu3 %vm264_vm0, %v672_v43 }
  0xb4   : > { %v373_v46 = vpop.f32.mrf.mxu2  ;;  %v414_v47 = vpop.f32.mrf.mxu3 }
  0xb5   : > { %v293_v48 = vpop.f32.mrf.mxu0  ;;  %v334_v49 = vpop.f32.mrf.mxu1  ;;  %v447_v58 = vpack.c.bf16 %v373_v46, %v373_v46  ;;  %v455_v59 = vpack.c.bf16 %v414_v47, %v414_v47 }
  0xb6   : > { %v432_v52 = vpack.c.bf16 %v293_v48, %v293_v48  ;;  %v440_v53 = vpack.c.bf16 %v334_v49, %v334_v49 }
  0xb7   : > { %v605_v2 = vunpack.c.l.b16 %v447_v58  ;;  %v666_v3 = vunpack.c.l.b16 %v455_v59 }
  0xb8   : > { %v472_v54 = vunpack.c.l.b16 %v432_v52  ;;  %v545_v55 = vunpack.c.l.b16 %v440_v53 }
  0xba   : > { %v478_v56 = vpack.c.b16 %v472_v54, %v471_v50  ;;  %v551_v57 = vpack.c.b16 %v545_v55, %v544_v51 }
  0xbc   : > { %v375_v60 = vpop.f32.mrf.mxu2  ;;  %v416_v61 = vpop.f32.mrf.mxu3  ;;  %932 = vmatmul.msk.bf16.gmra.mxu0 %vm264_vm0, %v478_v56  ;;  %936 = vmatmul.msk.bf16.gmra.mxu1 %vm264_vm0, %v551_v57 }
  0xbd   : > { %v448_v62 = vpack.c.bf16 %v375_v60, %v375_v60  ;;  %v456_v63 = vpack.c.bf16 %v416_v61, %v416_v61  ;;  %v296_v0 = vpop.f32.mrf.mxu0  ;;  %v337_v1 = vpop.f32.mrf.mxu1 }
  0xbe   : > { %v433_v8 = vpack.c.bf16 %v296_v0, %v296_v0  ;;  %v441_v9 = vpack.c.bf16 %v337_v1, %v337_v1 }
  0xbf   : > { %v606_v4 = vunpack.c.l.b16 %v448_v62  ;;  %v667_v5 = vunpack.c.l.b16 %v456_v63 }
  0xc0   : > { %v473_v14 = vunpack.c.l.b16 %v433_v8  ;;  %v546_v15 = vunpack.c.l.b16 %v441_v9 }
  0xc1   : > { %v612_v6 = vpack.c.b16 %v606_v4, %v605_v2  ;;  %v673_v7 = vpack.c.b16 %v667_v5, %v666_v3 }
  0xc3   : > { %940 = vmatmul.msk.bf16.gmra.mxu2 %vm264_vm0, %v612_v6  ;;  %944 = vmatmul.msk.bf16.gmra.mxu3 %vm264_vm0, %v673_v7 }
  0xc4   : > { %v378_v10 = vpop.f32.mrf.mxu2  ;;  %v419_v11 = vpop.f32.mrf.mxu3 }
  0xc5   : > { %v298_v12 = vpop.f32.mrf.mxu0  ;;  %v339_v13 = vpop.f32.mrf.mxu1  ;;  %v449_v22 = vpack.c.bf16 %v378_v10, %v378_v10  ;;  %v457_v23 = vpack.c.bf16 %v419_v11, %v419_v11 }
  0xc6   : > { %v434_v16 = vpack.c.bf16 %v298_v12, %v298_v12  ;;  %v442_v17 = vpack.c.bf16 %v339_v13, %v339_v13 }
  0xc7   : > { %v607_v30 = vunpack.c.l.b16 %v449_v22  ;;  %v668_v31 = vunpack.c.l.b16 %v457_v23 }
  0xc8   : > { %v474_v18 = vunpack.c.l.b16 %v434_v16  ;;  %v547_v19 = vunpack.c.l.b16 %v442_v17 }
  0xca   : > { %v479_v20 = vpack.c.b16 %v474_v18, %v473_v14  ;;  %v552_v21 = vpack.c.b16 %v547_v19, %v546_v15 }
  0xcc   : > { %v380_v24 = vpop.f32.mrf.mxu2  ;;  %v421_v25 = vpop.f32.mrf.mxu3  ;;  %933 = vmatmul.msk.bf16.gmra.mxu0 %vm264_vm0, %v479_v20  ;;  %937 = vmatmul.msk.bf16.gmra.mxu1 %vm264_vm0, %v552_v21 }
  0xcd   : > { %v450_v26 = vpack.c.bf16 %v380_v24, %v380_v24  ;;  %v458_v27 = vpack.c.bf16 %v421_v25, %v421_v25  ;;  %v301_v28 = vpop.f32.mrf.mxu0  ;;  %v342_v29 = vpop.f32.mrf.mxu1 }
  0xce   : > { %v435_v36 = vpack.c.bf16 %v301_v28, %v301_v28  ;;  %v443_v37 = vpack.c.bf16 %v342_v29, %v342_v29 }
  0xcf   : > { %v608_v32 = vunpack.c.l.b16 %v450_v26  ;;  %v669_v33 = vunpack.c.l.b16 %v458_v27 }
  0xd0   : > { %v475_v42 = vunpack.c.l.b16 %v435_v36  ;;  %v548_v43 = vunpack.c.l.b16 %v443_v37 }
  0xd1   : > { %v613_v34 = vpack.c.b16 %v608_v32, %v607_v30  ;;  %v674_v35 = vpack.c.b16 %v669_v33, %v668_v31 }
  0xd3   : > { %941 = vmatmul.msk.bf16.gmra.mxu2 %vm264_vm0, %v613_v34  ;;  %945 = vmatmul.msk.bf16.gmra.mxu3 %vm264_vm0, %v674_v35 }
  0xd4   : > { %v383_v38 = vpop.f32.mrf.mxu2  ;;  %v424_v39 = vpop.f32.mrf.mxu3 }
  0xd5   : > { %v303_v40 = vpop.f32.mrf.mxu0  ;;  %v344_v41 = vpop.f32.mrf.mxu1  ;;  %v451_v50 = vpack.c.bf16 %v383_v38, %v383_v38  ;;  %v459_v51 = vpack.c.bf16 %v424_v39, %v424_v39 }
  0xd6   : > { %v436_v44 = vpack.c.bf16 %v303_v40, %v303_v40  ;;  %v444_v45 = vpack.c.bf16 %v344_v41, %v344_v41 }
  0xd7   : > { %v609_v56 = vunpack.c.l.b16 %v451_v50  ;;  %v670_v57 = vunpack.c.l.b16 %v459_v51 }
  0xd8   : > { %v476_v46 = vunpack.c.l.b16 %v436_v44  ;;  %v549_v47 = vunpack.c.l.b16 %v444_v45 }
  0xda   : > { %v480_v48 = vpack.c.b16 %v476_v46, %v475_v42  ;;  %v553_v49 = vpack.c.b16 %v549_v47, %v548_v43 }
  0xdc   : > { %v385_v52 = vpop.f32.mrf.mxu2  ;;  %v426_v53 = vpop.f32.mrf.mxu3  ;;  %934 = vmatmul.msk.bf16.gmra.mxu0 %vm264_vm0, %v480_v48  ;;  %938 = vmatmul.msk.bf16.gmra.mxu1 %vm264_vm0, %v553_v49 }
  0xdd   : > { %v452_v54 = vpack.c.bf16 %v385_v52, %v385_v52  ;;  %v460_v55 = vpack.c.bf16 %v426_v53, %v426_v53 }
  0xdf   : > { %v610_v58 = vunpack.c.l.b16 %v452_v54  ;;  %v671_v59 = vunpack.c.l.b16 %v460_v55 }
  0xe1   : > { %v614_v60 = vpack.c.b16 %v610_v58, %v609_v56  ;;  %v675_v61 = vpack.c.b16 %v671_v59, %v670_v57 }
  0xe3   : > { %942 = vmatmul.msk.bf16.gmra.mxu2 %vm264_vm0, %v614_v60  ;;  %946 = vmatmul.msk.bf16.gmra.mxu3 %vm264_vm0, %v675_v61 }
 0x129   : > { %v514_v62 = vpop.f32.mrf.mxu0  ;;  %v575_v63 = vpop.f32.mrf.mxu1 }
 0x12a   : > { %718 = vst.msk [vmem:[%s1240_s28] sm:$0xff] %vm717_vm1, %v514_v62 }
 0x12b   : > { %726 = vst.msk [vmem:[%s1240_s28 + $0x40] sm:$0xff] %vm717_vm1, %v575_v63 }
 0x131   : > { %v516_v0 = vpop.f32.mrf.mxu0  ;;  %v577_v1 = vpop.f32.mrf.mxu1 }
 0x132   : > { %719 = vst.msk [vmem:[%s1240_s28 + $0x8] sm:$0xff] %vm717_vm1, %v516_v0 }
 0x133   : > { %727 = vst.msk [vmem:[%s1240_s28 + $0x48] sm:$0xff] %vm717_vm1, %v577_v1 }
 0x136   : > { %v636_v2 = vpop.f32.mrf.mxu2  ;;  %v697_v3 = vpop.f32.mrf.mxu3 }
 0x137   : > { %734 = vst.msk [vmem:[%s1240_s28 + $0x80] sm:$0xff] %vm717_vm1, %v636_v2 }
 0x138   : > { %742 = vst.msk [vmem:[%s1240_s28 + $0xc0] sm:$0xff] %vm717_vm1, %v697_v3 }
 0x139   : > { %v519_v4 = vpop.f32.mrf.mxu0  ;;  %v580_v5 = vpop.f32.mrf.mxu1 }
 0x13a   : > { %720 = vst.msk [vmem:[%s1240_s28 + $0x10] sm:$0xff] %vm717_vm1, %v519_v4 }
 0x13b   : > { %728 = vst.msk [vmem:[%s1240_s28 + $0x50] sm:$0xff] %vm717_vm1, %v580_v5 }
 0x13e   : > { %v638_v6 = vpop.f32.mrf.mxu2  ;;  %v699_v7 = vpop.f32.mrf.mxu3 }
 0x13f   : > { %735 = vst.msk [vmem:[%s1240_s28 + $0x88] sm:$0xff] %vm717_vm1, %v638_v6 }
 0x140   : > { %743 = vst.msk [vmem:[%s1240_s28 + $0xc8] sm:$0xff] %vm717_vm1, %v699_v7 }
 0x141   : > { %v521_v8 = vpop.f32.mrf.mxu0  ;;  %v582_v9 = vpop.f32.mrf.mxu1 }
 0x142   : > { %721 = vst.msk [vmem:[%s1240_s28 + $0x18] sm:$0xff] %vm717_vm1, %v521_v8 }
 0x143   : > { %729 = vst.msk [vmem:[%s1240_s28 + $0x58] sm:$0xff] %vm717_vm1, %v582_v9 }
 0x146   : > { %v641_v10 = vpop.f32.mrf.mxu2  ;;  %v702_v11 = vpop.f32.mrf.mxu3 }
 0x147   : > { %736 = vst.msk [vmem:[%s1240_s28 + $0x90] sm:$0xff] %vm717_vm1, %v641_v10 }
 0x148   : > { %744 = vst.msk [vmem:[%s1240_s28 + $0xd0] sm:$0xff] %vm717_vm1, %v702_v11 }
 0x149   : > { %v524_v12 = vpop.f32.mrf.mxu0  ;;  %v585_v13 = vpop.f32.mrf.mxu1 }
 0x14a   : > { %722 = vst.msk [vmem:[%s1240_s28 + $0x20] sm:$0xff] %vm717_vm1, %v524_v12 }
 0x14b   : > { %730 = vst.msk [vmem:[%s1240_s28 + $0x60] sm:$0xff] %vm717_vm1, %v585_v13 }
 0x14e   : > { %v643_v14 = vpop.f32.mrf.mxu2  ;;  %v704_v15 = vpop.f32.mrf.mxu3 }
 0x14f   : > { %737 = vst.msk [vmem:[%s1240_s28 + $0x98] sm:$0xff] %vm717_vm1, %v643_v14 }
 0x150   : > { %745 = vst.msk [vmem:[%s1240_s28 + $0xd8] sm:$0xff] %vm717_vm1, %v704_v15 }
 0x151   : > { %v526_v16 = vpop.f32.mrf.mxu0  ;;  %v587_v17 = vpop.f32.mrf.mxu1 }
 0x152   : > { %723 = vst.msk [vmem:[%s1240_s28 + $0x28] sm:$0xff] %vm717_vm1, %v526_v16 }
 0x153   : > { %731 = vst.msk [vmem:[%s1240_s28 + $0x68] sm:$0xff] %vm717_vm1, %v587_v17 }
 0x156   : > { %v646_v18 = vpop.f32.mrf.mxu2  ;;  %v707_v19 = vpop.f32.mrf.mxu3 }
 0x157   : > { %738 = vst.msk [vmem:[%s1240_s28 + $0xa0] sm:$0xff] %vm717_vm1, %v646_v18 }
 0x158   : > { %746 = vst.msk [vmem:[%s1240_s28 + $0xe0] sm:$0xff] %vm717_vm1, %v707_v19 }
 0x159   : > { %v529_v20 = vpop.f32.mrf.mxu0  ;;  %v590_v21 = vpop.f32.mrf.mxu1 }
 0x15a   : > { %724 = vst.msk [vmem:[%s1240_s28 + $0x30] sm:$0xff] %vm717_vm1, %v529_v20 }
 0x15b   : > { %732 = vst.msk [vmem:[%s1240_s28 + $0x70] sm:$0xff] %vm717_vm1, %v590_v21 }
 0x15e   : > { %v648_v22 = vpop.f32.mrf.mxu2  ;;  %v709_v23 = vpop.f32.mrf.mxu3 }
 0x15f   : > { %739 = vst.msk [vmem:[%s1240_s28 + $0xa8] sm:$0xff] %vm717_vm1, %v648_v22 }
 0x160   : > { %747 = vst.msk [vmem:[%s1240_s28 + $0xe8] sm:$0xff] %vm717_vm1, %v709_v23 }
 0x161   : > { %v531_v24 = vpop.f32.mrf.mxu0  ;;  %v592_v25 = vpop.f32.mrf.mxu1 }
 0x162   : > { %725 = vst.msk [vmem:[%s1240_s28 + $0x38] sm:$0xff] %vm717_vm1, %v531_v24 }
 0x163   : > { %733 = vst.msk [vmem:[%s1240_s28 + $0x78] sm:$0xff] %vm717_vm1, %v592_v25 }
 0x166   : > { %v651_v26 = vpop.f32.mrf.mxu2  ;;  %v712_v27 = vpop.f32.mrf.mxu3 }
 0x167   : > { %740 = vst.msk [vmem:[%s1240_s28 + $0xb0] sm:$0xff] %vm717_vm1, %v651_v26 }
 0x168   : > { %748 = vst.msk [vmem:[%s1240_s28 + $0xf0] sm:$0xff] %vm717_vm1, %v712_v27 }
 0x16e   : > { %v653_v28 = vpop.f32.mrf.mxu2  ;;  %v714_v29 = vpop.f32.mrf.mxu3 }
 0x16f   : > { %741 = vst.msk [vmem:[%s1240_s28 + $0xb8] sm:$0xff] %vm717_vm1, %v653_v28 }
 0x170   : > { %749 = vst.msk [vmem:[%s1240_s28 + $0xf8] sm:$0xff] %vm717_vm1, %v714_v29 }
 0x171   : > { %1052 = shalt.err (!%p1049_p5)
}
 0x172   : > { %s1105_s23 = smov 128   ;;  %s1106_s26 = smov 8  }
 0x173   : > { %968 = dma.vmem_to_hbm [thread:$0]  (%p1167_p4), %s767_s6, 4096, %s769_s7, %s751_s15, %s1105_s23, %s1105_s23, %s1106_s26  }
 0x174 PF: > { %p974_p6 = scmp.ge.s32.totalorder %s1103_s17, 2  ;;  %s783_s27 = sand.u32 1, %s1083_s12  }
 0x175   : > { %s784_s28 = scalar_lea.sflag [#allocation3], %s783_s27 }
 0x176   : > { %p971_p7 = pnand %p974_p6, %p1174_p8 }
 0x178   : > { %p972_p9 = pneg %p971_p7 }
 0x17a   : > { %1078 = dma.done.wait (%p972_p9), %s784_s28, 4096  }
 0x17b   : > { %1080 = vsyncadd (%p972_p9), %s784_s28, 4294963200  ;;  %s16_s17 = sadd.s32 1, %s1103_s17   ;;  %s1351_s12 = smov %s1087_s13 }
 0x17c   : > { %p13_p10 = scmp.ge.s32.totalorder %s16_s17, 4   ;;  %s1352_s13 = smov %s1091_s14 }
 0x17d   : > { %s1353_s14 = smov %s1180_s25  ;;  %s1354_s15 = smov %s1099_s16 }
 0x17e   : > { %s1355_s16 = smov %s1357_s20  ;;  %15 = sbr.rel (!%p13_p10) target bundleno = 4 (0x4), region = 67 }
 0x183   :  { %790 = vsyncpa [#allocation3], 1 }
 0x184   :  { %792 = vsyncpa [#allocation3 + $0x1], 1 }

</bundles_post_ra>
